<compile_context>
chip_gen: v7x
topology: tpu7x:2x2x1
jax: 0.10.0
libtpu: 0.0.40
codegen_flags: <defaults>
</compile_context>

<pallas_src>
import math
import numpy as np
import jax
import jax.numpy as jnp
from jax.experimental import pallas as pl
from jax.experimental.pallas import tpu as pltpu


def _round_up(v, m):
    return (v + m - 1) // m * m


def mog_gru_kernel(bs_ref,                       # scalar-prefetch: (T_pad,) int32 SMEM
                   x_ref,                        # (C, Bp, I)          f32
                   q_ref, r_ref,                 # (Hp, I), (I, Hp)    bf16
                   wi_ref, wh_ref,               # (I, 3Hp), (Hp, 3Hp) bf16 (gates fused)
                   bx_ref, bhn_ref,              # (1, 3Hp), (1, Hp)   f32
                   out_ref,                      # (C, Bp, Hp)         f32
                   h_ref):                       # VMEM scratch (Bp, Hp) f32
    d = pl.program_id(0)                  # 0 = forward cell, 1 = backward cell
    c = pl.program_id(1)                  # time-chunk grid index
    nc = pl.num_programs(1)
    C, _, _ = x_ref.shape
    Hp = h_ref.shape[1]

    @pl.when(c == 0)
    def _():
        h_ref[...] = jnp.zeros_like(h_ref)

    # which chunk of the (padded) time axis this grid step handles
    chunk = d * (nc - 1) + (1 - 2 * d) * c
    t_base = chunk * C

    # weights / biases: loaded once per grid step, reused for all C timesteps
    Q = q_ref[...]
    R = r_ref[...]
    Wi = wi_ref[...]
    Wh = wh_ref[...]
    bx = bx_ref[...]          # (1, 3Hp) = [bi_r+bh_r | bi_z+bh_z | bi_n]
    bhn = bhn_ref[...]        # (1, Hp)  = bh_n  (gated by r, kept separate)

    def dot(a, b):            # bf16 MXU operands, f32 accumulation (no HIGHEST)
        return jnp.dot(a.astype(jnp.bfloat16), b,
                       preferred_element_type=jnp.float32)

    def step(j, h):
        # position inside the chunk (reversed iteration for the backward cell)
        local = d * (C - 1) + (1 - 2 * d) * j
        bs = bs_ref[t_base + local]        # number of valid rows at this timestep
        x = x_ref[local]                   # (Bp, I) f32
        hp = h

        # --- mogrify: the 4 hard-coded alternations of the torch module ---
        # (with h == 0 this is the identity on x and keeps h == 0, which
        #  reproduces the t == 0 branch `grucell(xt)` with no hidden state)
        x = 2.0 * jax.nn.sigmoid(dot(h, Q)) * x
        h = 2.0 * jax.nn.sigmoid(dot(x, R)) * h
        x = 2.0 * jax.nn.sigmoid(dot(h, Q)) * x
        h = 2.0 * jax.nn.sigmoid(dot(x, R)) * h

        # --- GRUCell, PyTorch gate order (r, z, n), gates fused on the N dim ---
        gx = dot(x, Wi) + bx               # (Bp, 3Hp)
        gh = dot(h, Wh)                    # (Bp, 3Hp)
        r = jax.nn.sigmoid(gx[:, 0:Hp] + gh[:, 0:Hp])
        z = jax.nn.sigmoid(gx[:, Hp:2 * Hp] + gh[:, Hp:2 * Hp])
        n = jnp.tanh(gx[:, 2 * Hp:3 * Hp] + r * (gh[:, 2 * Hp:3 * Hp] + bhn))
        h_new = (1.0 - z) * n + z * h

        # rows >= bs are padding / finished sequences: freeze previous state
        # (exactly the ht_pre_temp_* buffers of the torch loop)
        row = jax.lax.broadcasted_iota(jnp.int32, h_new.shape, 0)
        h_upd = jnp.where(row < bs, h_new, hp)

        out_ref[local] = h_upd
        return h_upd

    h_final = jax.lax.fori_loop(0, C, step, h_ref[...], unroll=True)
    h_ref[...] = h_final


def mog_gru_pallas(x_padded, batch_sizes, params, *, chunk=4):
    """x_padded: (T, B, I) f32 time-major padded input (padding rows zeroed).
    batch_sizes: (T,) host ints, packed-sequence convention (non-increasing).
    Returns packed hidden states (total_tokens, H) = ht_fw + ht_bw."""
    T, B, I = x_padded.shape
    H = params["Q"].shape[1]

    Bp = _round_up(B, 8)                 # sublane-dense rows
    Hp = _round_up(H, 128)               # lane-dense hidden dim
    C = int(chunk)
    T_pad = _round_up(T, C)
    nc = T_pad // C

    bs_np = np.asarray(batch_sizes, dtype=np.int32)
    bs_full = np.zeros((T_pad,), np.int32)
    bs_full[:T] = bs_np                  # padded timesteps get bs=0 -> frozen rows

    x_full = jnp.zeros((T_pad, Bp, I), jnp.float32)
    x_full = x_full.at[:T, :B, :].set(x_padded.astype(jnp.float32))

    # ---- weight prep: pad H -> Hp, fuse gates on the output dim, cast bf16 ----
    Q = jnp.pad(params["Q"], ((0, 0), (0, Hp - H), (0, 0))).astype(jnp.bfloat16)   # (2,Hp,I)
    R = jnp.pad(params["R"], ((0, 0), (0, 0), (0, Hp - H))).astype(jnp.bfloat16)   # (2,I,Hp)

    def fuse(w, rows_to):   # (2, 3, A, H) -> (2, rows_to, 3*Hp), gate order r|z|n
        a = w.shape[2]
        w = jnp.pad(w, ((0, 0), (0, 0), (0, rows_to - a), (0, Hp - H)))
        return jnp.concatenate([w[:, 0], w[:, 1], w[:, 2]], axis=-1)

    Wi = fuse(params["Wi"], I).astype(jnp.bfloat16)     # (2, I,  3Hp)
    Wh = fuse(params["Wh"], Hp).astype(jnp.bfloat16)    # (2, Hp, 3Hp)

    bi = jnp.pad(params["bi"], ((0, 0), (0, 0), (0, Hp - H)))
    bh = jnp.pad(params["bh"], ((0, 0), (0, 0), (0, Hp - H)))
    b_x = jnp.concatenate([bi[:, 0] + bh[:, 0], bi[:, 1] + bh[:, 1], bi[:, 2]],
                          axis=-1)[:, None, :]          # (2, 1, 3Hp) f32
    b_hn = bh[:, 2][:, None, :]                         # (2, 1, Hp)  f32

    # Weight blocks have a constant block index along the time axis, so Pallas
    # does not re-DMA them between chunks; their double-buffer footprint is tiny.
    out = pl.pallas_call(
        mog_gru_kernel,
        out_shape=jax.ShapeDtypeStruct((2, T_pad, Bp, Hp), jnp.float32),
        grid_spec=pltpu.PrefetchScalarGridSpec(
            num_scalar_prefetch=1,
            grid=(2, nc),
            in_specs=[
                # x: chunk c of the time axis (reversed chunk order for d == 1)
                pl.BlockSpec((C, Bp, I),
                             lambda d, c, bs: (d * (nc - 1) + (1 - 2 * d) * c, 0, 0)),
                pl.BlockSpec((None, Hp, I),      lambda d, c, bs: (d, 0, 0)),   # Q
                pl.BlockSpec((None, I, Hp),      lambda d, c, bs: (d, 0, 0)),   # R
                pl.BlockSpec((None, I, 3 * Hp),  lambda d, c, bs: (d, 0, 0)),   # Wi fused
                pl.BlockSpec((None, Hp, 3 * Hp), lambda d, c, bs: (d, 0, 0)),   # Wh fused
                pl.BlockSpec((None, 1, 3 * Hp),  lambda d, c, bs: (d, 0, 0)),   # b_x
                pl.BlockSpec((None, 1, Hp),      lambda d, c, bs: (d, 0, 0)),   # b_hn
            ],
            out_specs=pl.BlockSpec(
                (None, C, Bp, Hp),
                lambda d, c, bs: (d, d * (nc - 1) + (1 - 2 * d) * c, 0, 0)),
            scratch_shapes=[pltpu.VMEM((Bp, Hp), jnp.float32)],
        ),
        compiler_params=pltpu.CompilerParams(
            # On v7x the direction axis could be CORE_PARALLEL (the two cells are
            # independent, each resets its scratch at c == 0); kept "arbitrary"
            # here so the same build runs on single-core v5e/v6e.
            dimension_semantics=("arbitrary", "arbitrary")),
    )(jnp.asarray(bs_full), x_full, Q, R, Wi, Wh, b_x, b_hn)

    # torch.add(ht_fw, ht_bw), then re-pack to the PackedSequence data layout with
    # a single precomputed gather (no per-timestep host loop of slices/concat).
    h_sum = (out[0] + out[1]).reshape(T_pad * Bp, Hp)
    pack_idx = np.concatenate(
        [t * Bp + np.arange(int(bs_np[t])) for t in range(T)]).astype(np.int32)
    return jnp.take(h_sum, jnp.asarray(pack_idx), axis=0)[:, :H]


def init_params(key, input_size, hidden_size):
    """Deterministic synthetic init mirroring init_weights(): xavier-uniform for
    >=2D params, zeros for 1-D biases.  GRUCell weights stored per-gate and
    transposed to (in_features, hidden) so the kernel computes x @ W."""
    k = jax.random.split(key, 4)

    def xavier(kk, shape, fan_in, fan_out):
        a = math.sqrt(6.0 / (fan_in + fan_out))
        return jax.random.uniform(kk, shape, jnp.float32, -a, a)

    Q = xavier(k[0], (2, hidden_size, input_size), hidden_size, input_size)
    R = xavier(k[1], (2, input_size, hidden_size), input_size, hidden_size)
    Wi = xavier(k[2], (2, 3, input_size, hidden_size), input_size, 3 * hidden_size)
    Wh = xavier(k[3], (2, 3, hidden_size, hidden_size), hidden_size, 3 * hidden_size)
    bi = jnp.zeros((2, 3, hidden_size), jnp.float32)
    bh = jnp.zeros((2, 3, hidden_size), jnp.float32)
    return dict(Q=Q, R=R, Wi=Wi, Wh=Wh, bi=bi, bh=bh)


def ref_packed_numpy(data, batch_sizes, params, hidden_size):
    """Pure-numpy (f32) replica of the torch packed-sequence loop (fw + bw)."""
    data = np.asarray(data, np.float32)
    Q = np.asarray(params["Q"]); R = np.asarray(params["R"])
    Wi = np.asarray(params["Wi"]); Wh = np.asarray(params["Wh"])
    bi = np.asarray(params["bi"]); bh = np.asarray(params["bh"])

    def sig(v):
        return 1.0 / (1.0 + np.exp(-v))

    def gru(x, h, d):
        r = sig(x @ Wi[d, 0] + bi[d, 0] + h @ Wh[d, 0] + bh[d, 0])
        z = sig(x @ Wi[d, 1] + bi[d, 1] + h @ Wh[d, 1] + bh[d, 1])
        n = np.tanh(x @ Wi[d, 2] + bi[d, 2] + r * (h @ Wh[d, 2] + bh[d, 2]))
        return (1.0 - z) * n + z * h

    def mogrify(x, h, d):
        x = 2.0 * sig(h @ Q[d]) * x
        h = 2.0 * sig(x @ R[d]) * h
        x = 2.0 * sig(h @ Q[d]) * x
        h = 2.0 * sig(x @ R[d]) * h
        return x, h

    total = data.shape[0]
    H = hidden_size
    ht_fw = np.zeros((total, H), np.float32)
    ht_bw = np.zeros((total, H), np.float32)
    bs = [int(b) for b in batch_sizes]

    # forward
    h_tmp = np.zeros((bs[0], H), np.float32)
    start = 0
    for t, mb in enumerate(bs):
        end = start + mb
        xt = data[start:end]
        if t == 0:
            h_tmp[:mb] = gru(xt, np.zeros((mb, H), np.float32), 0)
        else:
            hp = h_tmp[:mb].copy()
            xm, hp = mogrify(xt, hp, 0)
            h_tmp[:mb] = gru(xm, hp, 0)
        ht_fw[start:end] = h_tmp[:mb]
        start = end

    # backward
    bsf = bs[::-1]
    h_tmp = np.zeros((bsf[-1], H), np.float32)
    end = total
    for t, mb in enumerate(bsf):
        start = end - mb
        xt = data[start:end]
        if t == 0:
            h_tmp[:mb] = gru(xt, np.zeros((mb, H), np.float32), 1)
        else:
            hp = h_tmp[:mb].copy()
            xm, hp = mogrify(xt, hp, 1)
            h_tmp[:mb] = gru(xm, hp, 1)
        ht_bw[start:end] = h_tmp[:mb]
        end = start

    return ht_fw + ht_bw


if __name__ == "__main__":
    input_size, hidden_size = 16, 32
    lengths = [11, 10, 9, 7, 4, 3]            # sorted descending (packed convention)
    B, T = len(lengths), max(lengths)
    batch_sizes = np.array([sum(1 for L in lengths if L > t) for t in range(T)],
                           dtype=np.int32)

    key = jax.random.PRNGKey(0)
    kx, kp = jax.random.split(key)
    x_padded = jax.random.normal(kx, (T, B, input_size), jnp.float32)
    # zero the padding rows so the padded tensor mirrors packed data exactly
    vmask = (np.arange(B)[None, :] < batch_sizes[:, None]).astype(np.float32)
    x_padded = x_padded * jnp.asarray(vmask)[:, :, None]

    params = init_params(kp, input_size, hidden_size)

    out_packed = mog_gru_pallas(x_padded, batch_sizes, params, chunk=4)
    out_packed = jax.block_until_ready(out_packed)

    # verify against a numpy replica of the torch packed-sequence loop.
    # Tolerance is loosened vs v1: matmuls now use bf16 MXU operands (default
    # precision / bf16 weights) against an f32 reference, across an 11-step
    # bidirectional recurrence with 2x mogrifier scaling.
    data_packed = np.concatenate(
        [np.asarray(x_padded)[t, : batch_sizes[t]] for t in range(T)], axis=0)
    ref = ref_packed_numpy(data_packed, batch_sizes, params, hidden_size)
    np.testing.assert_allclose(np.asarray(out_packed), ref, rtol=5e-2, atol=5e-2)

    print("KERNEL_OK")
</pallas_src>

<mosaic_0001>
module attributes {stable_mosaic.version = 11 : i64} {
  func.func @mog_gru_kernel(%arg0: i32, %arg1: i32, %arg2: memref<12xi32, #tpu.memory_space<smem>>, %arg3: memref<4x8x16xf32, #tpu.memory_space<vmem>>, %arg4: memref<1x128x16xbf16, #tpu.memory_space<vmem>>, %arg5: memref<1x16x128xbf16, #tpu.memory_space<vmem>>, %arg6: memref<1x16x384xbf16, #tpu.memory_space<vmem>>, %arg7: memref<1x128x384xbf16, #tpu.memory_space<vmem>>, %arg8: memref<1x1x384xf32, #tpu.memory_space<vmem>>, %arg9: memref<1x1x128xf32, #tpu.memory_space<vmem>>, %arg10: memref<1x4x8x128xf32, #tpu.memory_space<vmem>>, %arg11: memref<8x128xf32, #tpu.memory_space<vmem>>) attributes {dimension_semantics = [#tpu.dimension_semantics<arbitrary>, #tpu.dimension_semantics<arbitrary>], iteration_bounds = array<i64: 2, 3>, scalar_prefetch = 1 : i64, scratch_operands = 1 : i64, tpu.core_type = #tpu.core_type<tc>, window_params = [{transform_indices = @transform_0, window_bounds = array<i64: 4, 8, 16>}, {transform_indices = @transform_1, window_bounds = array<i64: 1, 128, 16>}, {transform_indices = @transform_2, window_bounds = array<i64: 1, 16, 128>}, {transform_indices = @transform_3, window_bounds = array<i64: 1, 16, 384>}, {transform_indices = @transform_4, window_bounds = array<i64: 1, 128, 384>}, {transform_indices = @transform_5, window_bounds = array<i64: 1, 1, 384>}, {transform_indices = @transform_6, window_bounds = array<i64: 1, 1, 128>}, {transform_indices = @transform_7, window_bounds = array<i64: 1, 4, 8, 128>}]} {
    %c0_i32 = arith.constant 0 : i32
    %0 = arith.cmpi eq, %arg1, %c0_i32 : i32
    %1 = arith.extui %0 : i1 to i32
    %c0_i32_0 = arith.constant 0 : i32
    %2 = arith.cmpi ne, %1, %c0_i32_0 : i32
    scf.if %2 {
      %cst_126 = arith.constant 0.000000e+00 : f32
      %395 = vector.broadcast %cst_126 : f32 to vector<8x128xf32>
      %c0_127 = arith.constant 0 : index
      %c0_128 = arith.constant 0 : index
      %396 = vector.load %arg11[%c0_127, %c0_128] : memref<8x128xf32, #tpu.memory_space<vmem>>, vector<8x128xf32>
      tpu.vector_store %arg11[%c0_127, %c0_128], %395 {strides = array<i32>} : memref<8x128xf32, #tpu.memory_space<vmem>>, vector<8x128xf32>,
    } else {
    }
    %c2_i32 = arith.constant 2 : i32
    %3 = arith.muli %arg0, %c2_i32 : i32
    %c2_i32_1 = arith.constant 2 : i32
    %4 = arith.muli %c2_i32_1, %arg0 : i32
    %c1_i32 = arith.constant 1 : i32
    %5 = arith.subi %c1_i32, %4 : i32
    %6 = arith.muli %5, %arg1 : i32
    %7 = arith.addi %3, %6 : i32
    %c4_i32 = arith.constant 4 : i32
    %8 = arith.muli %7, %c4_i32 : i32
    %c0 = arith.constant 0 : index
    %c0_2 = arith.constant 0 : index
    %c0_3 = arith.constant 0 : index
    %9 = vector.load %arg4[%c0, %c0_2, %c0_3] : memref<1x128x16xbf16, #tpu.memory_space<vmem>>, vector<1x128x16xbf16>
    %10 = vector.shape_cast %9 : vector<1x128x16xbf16> to vector<128x16xbf16>
    %c0_4 = arith.constant 0 : index
    %c0_5 = arith.constant 0 : index
    %c0_6 = arith.constant 0 : index
    %11 = vector.load %arg5[%c0_4, %c0_5, %c0_6] : memref<1x16x128xbf16, #tpu.memory_space<vmem>>, vector<1x16x128xbf16>
    %12 = vector.shape_cast %11 : vector<1x16x128xbf16> to vector<16x128xbf16>
    %c0_7 = arith.constant 0 : index
    %c0_8 = arith.constant 0 : index
    %c0_9 = arith.constant 0 : index
    %13 = vector.load %arg6[%c0_7, %c0_8, %c0_9] : memref<1x16x384xbf16, #tpu.memory_space<vmem>>, vector<1x16x384xbf16>
    %14 = vector.shape_cast %13 : vector<1x16x384xbf16> to vector<16x384xbf16>
    %c0_10 = arith.constant 0 : index
    %c0_11 = arith.constant 0 : index
    %c0_12 = arith.constant 0 : index
    %15 = vector.load %arg7[%c0_10, %c0_11, %c0_12] : memref<1x128x384xbf16, #tpu.memory_space<vmem>>, vector<1x128x384xbf16>
    %16 = vector.shape_cast %15 : vector<1x128x384xbf16> to vector<128x384xbf16>
    %c0_13 = arith.constant 0 : index
    %c0_14 = arith.constant 0 : index
    %c0_15 = arith.constant 0 : index
    %17 = vector.load %arg8[%c0_13, %c0_14, %c0_15] : memref<1x1x384xf32, #tpu.memory_space<vmem>>, vector<1x1x384xf32>
    %18 = vector.shape_cast %17 : vector<1x1x384xf32> to vector<1x384xf32>
    %c0_16 = arith.constant 0 : index
    %c0_17 = arith.constant 0 : index
    %c0_18 = arith.constant 0 : index
    %19 = vector.load %arg9[%c0_16, %c0_17, %c0_18] : memref<1x1x128xf32, #tpu.memory_space<vmem>>, vector<1x1x128xf32>
    %20 = vector.shape_cast %19 : vector<1x1x128xf32> to vector<1x128xf32>
    %c0_19 = arith.constant 0 : index
    %c0_20 = arith.constant 0 : index
    %21 = vector.load %arg11[%c0_19, %c0_20] : memref<8x128xf32, #tpu.memory_space<vmem>>, vector<8x128xf32>
    %c0_i32_21 = arith.constant 0 : i32
    %c3_i32 = arith.constant 3 : i32
    %22 = arith.muli %arg0, %c3_i32 : i32
    %c2_i32_22 = arith.constant 2 : i32
    %23 = arith.muli %c2_i32_22, %arg0 : i32
    %c1_i32_23 = arith.constant 1 : i32
    %24 = arith.subi %c1_i32_23, %23 : i32
    %25 = arith.muli %24, %c0_i32_21 : i32
    %26 = arith.addi %22, %25 : i32
    %27 = arith.addi %8, %26 : i32
    %28 = arith.index_cast %27 : i32 to index
    %29 = memref.load %arg2[%28] : memref<12xi32, #tpu.memory_space<smem>>
    %30 = arith.index_cast %26 : i32 to index
    %c0_24 = arith.constant 0 : index
    %c0_25 = arith.constant 0 : index
    %31 = vector.load %arg3[%30, %c0_24, %c0_25] : memref<4x8x16xf32, #tpu.memory_space<vmem>>, vector<1x8x16xf32>
    %32 = vector.shape_cast %31 : vector<1x8x16xf32> to vector<8x16xf32>
    %33 = arith.truncf %21 : vector<8x128xf32> to vector<8x128xbf16>
    %cst = arith.constant dense<0.000000e+00> : vector<8x16xf32>
    %34 = tpu.matmul %33, %10, %cst {dimension_numbers = #tpu.dot_dimension_numbers<[1], [0], [0], [1], [0, 0, 1, 1], [], []>} : vector<8x128xbf16>, vector<128x16xbf16>, vector<8x16xf32> -> vector<8x16xf32>
    %35 = arith.negf %34 : vector<8x16xf32>
    %36 = math.exp %35 : vector<8x16xf32>
    %cst_26 = arith.constant 1.000000e+00 : f32
    %37 = vector.broadcast %cst_26 : f32 to vector<8x16xf32>
    %38 = arith.addf %37, %36 : vector<8x16xf32>
    %39 = arith.divf %37, %38 : vector<8x16xf32>
    %cst_27 = arith.constant 2.000000e+00 : f32
    %40 = vector.broadcast %cst_27 : f32 to vector<8x16xf32>
    %41 = arith.mulf %40, %39 : vector<8x16xf32>
    %42 = arith.mulf %41, %32 : vector<8x16xf32>
    %43 = arith.truncf %42 : vector<8x16xf32> to vector<8x16xbf16>
    %cst_28 = arith.constant dense<0.000000e+00> : vector<8x128xf32>
    %44 = tpu.matmul %43, %12, %cst_28 {dimension_numbers = #tpu.dot_dimension_numbers<[1], [0], [0], [1], [0, 0, 1, 1], [], []>} : vector<8x16xbf16>, vector<16x128xbf16>, vector<8x128xf32> -> vector<8x128xf32>
    %45 = arith.negf %44 : vector<8x128xf32>
    %46 = math.exp %45 : vector<8x128xf32>
    %cst_29 = arith.constant 1.000000e+00 : f32
    %47 = vector.broadcast %cst_29 : f32 to vector<8x128xf32>
    %48 = arith.addf %47, %46 : vector<8x128xf32>
    %49 = arith.divf %47, %48 : vector<8x128xf32>
    %cst_30 = arith.constant 2.000000e+00 : f32
    %50 = vector.broadcast %cst_30 : f32 to vector<8x128xf32>
    %51 = arith.mulf %50, %49 : vector<8x128xf32>
    %52 = arith.mulf %51, %21 : vector<8x128xf32>
    %53 = arith.truncf %52 : vector<8x128xf32> to vector<8x128xbf16>
    %cst_31 = arith.constant dense<0.000000e+00> : vector<8x16xf32>
    %54 = tpu.matmul %53, %10, %cst_31 {dimension_numbers = #tpu.dot_dimension_numbers<[1], [0], [0], [1], [0, 0, 1, 1], [], []>} : vector<8x128xbf16>, vector<128x16xbf16>, vector<8x16xf32> -> vector<8x16xf32>
    %55 = arith.negf %54 : vector<8x16xf32>
    %56 = math.exp %55 : vector<8x16xf32>
    %cst_32 = arith.constant 1.000000e+00 : f32
    %57 = vector.broadcast %cst_32 : f32 to vector<8x16xf32>
    %58 = arith.addf %57, %56 : vector<8x16xf32>
    %59 = arith.divf %57, %58 : vector<8x16xf32>
    %cst_33 = arith.constant 2.000000e+00 : f32
    %60 = vector.broadcast %cst_33 : f32 to vector<8x16xf32>
    %61 = arith.mulf %60, %59 : vector<8x16xf32>
    %62 = arith.mulf %61, %42 : vector<8x16xf32>
    %63 = arith.truncf %62 : vector<8x16xf32> to vector<8x16xbf16>
    %cst_34 = arith.constant dense<0.000000e+00> : vector<8x128xf32>
    %64 = tpu.matmul %63, %12, %cst_34 {dimension_numbers = #tpu.dot_dimension_numbers<[1], [0], [0], [1], [0, 0, 1, 1], [], []>} : vector<8x16xbf16>, vector<16x128xbf16>, vector<8x128xf32> -> vector<8x128xf32>
    %65 = arith.negf %64 : vector<8x128xf32>
    %66 = math.exp %65 : vector<8x128xf32>
    %cst_35 = arith.constant 1.000000e+00 : f32
    %67 = vector.broadcast %cst_35 : f32 to vector<8x128xf32>
    %68 = arith.addf %67, %66 : vector<8x128xf32>
    %69 = arith.divf %67, %68 : vector<8x128xf32>
    %cst_36 = arith.constant 2.000000e+00 : f32
    %70 = vector.broadcast %cst_36 : f32 to vector<8x128xf32>
    %71 = arith.mulf %70, %69 : vector<8x128xf32>
    %72 = arith.mulf %71, %52 : vector<8x128xf32>
    %73 = arith.truncf %62 : vector<8x16xf32> to vector<8x16xbf16>
    %cst_37 = arith.constant dense<0.000000e+00> : vector<8x384xf32>
    %74 = tpu.matmul %73, %14, %cst_37 {dimension_numbers = #tpu.dot_dimension_numbers<[1], [0], [0], [1], [0, 0, 1, 1], [], []>} : vector<8x16xbf16>, vector<16x384xbf16>, vector<8x384xf32> -> vector<8x384xf32>
    %75 = vector.broadcast %18 : vector<1x384xf32> to vector<8x384xf32>
    %76 = arith.addf %74, %75 : vector<8x384xf32>
    %77 = arith.truncf %72 : vector<8x128xf32> to vector<8x128xbf16>
    %cst_38 = arith.constant dense<0.000000e+00> : vector<8x384xf32>
    %78 = tpu.matmul %77, %16, %cst_38 {dimension_numbers = #tpu.dot_dimension_numbers<[1], [0], [0], [1], [0, 0, 1, 1], [], []>} : vector<8x128xbf16>, vector<128x384xbf16>, vector<8x384xf32> -> vector<8x384xf32>
    %79 = vector.extract_strided_slice %76 {offsets = [0, 0], sizes = [8, 128], strides = [1, 1]} : vector<8x384xf32> to vector<8x128xf32>
    %80 = vector.extract_strided_slice %78 {offsets = [0, 0], sizes = [8, 128], strides = [1, 1]} : vector<8x384xf32> to vector<8x128xf32>
    %81 = arith.addf %79, %80 : vector<8x128xf32>
    %82 = arith.negf %81 : vector<8x128xf32>
    %83 = math.exp %82 : vector<8x128xf32>
    %cst_39 = arith.constant 1.000000e+00 : f32
    %84 = vector.broadcast %cst_39 : f32 to vector<8x128xf32>
    %85 = arith.addf %84, %83 : vector<8x128xf32>
    %86 = arith.divf %84, %85 : vector<8x128xf32>
    %87 = vector.extract_strided_slice %76 {offsets = [0, 128], sizes = [8, 128], strides = [1, 1]} : vector<8x384xf32> to vector<8x128xf32>
    %88 = vector.extract_strided_slice %78 {offsets = [0, 128], sizes = [8, 128], strides = [1, 1]} : vector<8x384xf32> to vector<8x128xf32>
    %89 = arith.addf %87, %88 : vector<8x128xf32>
    %90 = arith.negf %89 : vector<8x128xf32>
    %91 = math.exp %90 : vector<8x128xf32>
    %cst_40 = arith.constant 1.000000e+00 : f32
    %92 = vector.broadcast %cst_40 : f32 to vector<8x128xf32>
    %93 = arith.addf %92, %91 : vector<8x128xf32>
    %94 = arith.divf %92, %93 : vector<8x128xf32>
    %95 = vector.extract_strided_slice %76 {offsets = [0, 256], sizes = [8, 128], strides = [1, 1]} : vector<8x384xf32> to vector<8x128xf32>
    %96 = vector.extract_strided_slice %78 {offsets = [0, 256], sizes = [8, 128], strides = [1, 1]} : vector<8x384xf32> to vector<8x128xf32>
    %97 = vector.broadcast %20 : vector<1x128xf32> to vector<8x128xf32>
    %98 = arith.addf %96, %97 : vector<8x128xf32>
    %99 = arith.mulf %86, %98 : vector<8x128xf32>
    %100 = arith.addf %95, %99 : vector<8x128xf32>
    %101 = math.tanh %100 : vector<8x128xf32>
    %cst_41 = arith.constant 1.000000e+00 : f32
    %102 = vector.broadcast %cst_41 : f32 to vector<8x128xf32>
    %103 = arith.subf %102, %94 : vector<8x128xf32>
    %104 = arith.mulf %103, %101 : vector<8x128xf32>
    %105 = arith.mulf %94, %72 : vector<8x128xf32>
    %106 = arith.addf %104, %105 : vector<8x128xf32>
    %107 = tpu.iota {dimensions = array<i32: 0>} : vector<8x128xi32>
    %108 = vector.broadcast %29 : i32 to vector<8x128xi32>
    %109 = arith.cmpi slt, %107, %108 : vector<8x128xi32>
    %110 = arith.select %109, %106, %21 : vector<8x128xi1>, vector<8x128xf32>
    %c0_42 = arith.constant 0 : index
    %111 = arith.index_cast %26 : i32 to index
    %c0_43 = arith.constant 0 : index
    %c0_44 = arith.constant 0 : index
    %112 = vector.load %arg10[%c0_42, %111, %c0_43, %c0_44] : memref<1x4x8x128xf32, #tpu.memory_space<vmem>>, vector<1x1x8x128xf32>
    %113 = vector.shape_cast %112 : vector<1x1x8x128xf32> to vector<8x128xf32>
    %114 = vector.shape_cast %110 : vector<8x128xf32> to vector<1x1x8x128xf32>
    tpu.vector_store %arg10[%c0_42, %111, %c0_43, %c0_44], %114 {strides = array<i32>} : memref<1x4x8x128xf32, #tpu.memory_space<vmem>>, vector<1x1x8x128xf32>,
    %c1_i32_45 = arith.constant 1 : i32
    %c3_i32_46 = arith.constant 3 : i32
    %115 = arith.muli %arg0, %c3_i32_46 : i32
    %c2_i32_47 = arith.constant 2 : i32
    %116 = arith.muli %c2_i32_47, %arg0 : i32
    %c1_i32_48 = arith.constant 1 : i32
    %117 = arith.subi %c1_i32_48, %116 : i32
    %118 = arith.muli %117, %c1_i32_45 : i32
    %119 = arith.addi %115, %118 : i32
    %120 = arith.addi %8, %119 : i32
    %121 = arith.index_cast %120 : i32 to index
    %122 = memref.load %arg2[%121] : memref<12xi32, #tpu.memory_space<smem>>
    %123 = arith.index_cast %119 : i32 to index
    %c0_49 = arith.constant 0 : index
    %c0_50 = arith.constant 0 : index
    %124 = vector.load %arg3[%123, %c0_49, %c0_50] : memref<4x8x16xf32, #tpu.memory_space<vmem>>, vector<1x8x16xf32>
    %125 = vector.shape_cast %124 : vector<1x8x16xf32> to vector<8x16xf32>
    %126 = arith.truncf %110 : vector<8x128xf32> to vector<8x128xbf16>
    %cst_51 = arith.constant dense<0.000000e+00> : vector<8x16xf32>
    %127 = tpu.matmul %126, %10, %cst_51 {dimension_numbers = #tpu.dot_dimension_numbers<[1], [0], [0], [1], [0, 0, 1, 1], [], []>} : vector<8x128xbf16>, vector<128x16xbf16>, vector<8x16xf32> -> vector<8x16xf32>
    %128 = arith.negf %127 : vector<8x16xf32>
    %129 = math.exp %128 : vector<8x16xf32>
    %cst_52 = arith.constant 1.000000e+00 : f32
    %130 = vector.broadcast %cst_52 : f32 to vector<8x16xf32>
    %131 = arith.addf %130, %129 : vector<8x16xf32>
    %132 = arith.divf %130, %131 : vector<8x16xf32>
    %cst_53 = arith.constant 2.000000e+00 : f32
    %133 = vector.broadcast %cst_53 : f32 to vector<8x16xf32>
    %134 = arith.mulf %133, %132 : vector<8x16xf32>
    %135 = arith.mulf %134, %125 : vector<8x16xf32>
    %136 = arith.truncf %135 : vector<8x16xf32> to vector<8x16xbf16>
    %cst_54 = arith.constant dense<0.000000e+00> : vector<8x128xf32>
    %137 = tpu.matmul %136, %12, %cst_54 {dimension_numbers = #tpu.dot_dimension_numbers<[1], [0], [0], [1], [0, 0, 1, 1], [], []>} : vector<8x16xbf16>, vector<16x128xbf16>, vector<8x128xf32> -> vector<8x128xf32>
    %138 = arith.negf %137 : vector<8x128xf32>
    %139 = math.exp %138 : vector<8x128xf32>
    %cst_55 = arith.constant 1.000000e+00 : f32
    %140 = vector.broadcast %cst_55 : f32 to vector<8x128xf32>
    %141 = arith.addf %140, %139 : vector<8x128xf32>
    %142 = arith.divf %140, %141 : vector<8x128xf32>
    %cst_56 = arith.constant 2.000000e+00 : f32
    %143 = vector.broadcast %cst_56 : f32 to vector<8x128xf32>
    %144 = arith.mulf %143, %142 : vector<8x128xf32>
    %145 = arith.mulf %144, %110 : vector<8x128xf32>
    %146 = arith.truncf %145 : vector<8x128xf32> to vector<8x128xbf16>
    %cst_57 = arith.constant dense<0.000000e+00> : vector<8x16xf32>
    %147 = tpu.matmul %146, %10, %cst_57 {dimension_numbers = #tpu.dot_dimension_numbers<[1], [0], [0], [1], [0, 0, 1, 1], [], []>} : vector<8x128xbf16>, vector<128x16xbf16>, vector<8x16xf32> -> vector<8x16xf32>
    %148 = arith.negf %147 : vector<8x16xf32>
    %149 = math.exp %148 : vector<8x16xf32>
    %cst_58 = arith.constant 1.000000e+00 : f32
    %150 = vector.broadcast %cst_58 : f32 to vector<8x16xf32>
    %151 = arith.addf %150, %149 : vector<8x16xf32>
    %152 = arith.divf %150, %151 : vector<8x16xf32>
    %cst_59 = arith.constant 2.000000e+00 : f32
    %153 = vector.broadcast %cst_59 : f32 to vector<8x16xf32>
    %154 = arith.mulf %153, %152 : vector<8x16xf32>
    %155 = arith.mulf %154, %135 : vector<8x16xf32>
    %156 = arith.truncf %155 : vector<8x16xf32> to vector<8x16xbf16>
    %cst_60 = arith.constant dense<0.000000e+00> : vector<8x128xf32>
    %157 = tpu.matmul %156, %12, %cst_60 {dimension_numbers = #tpu.dot_dimension_numbers<[1], [0], [0], [1], [0, 0, 1, 1], [], []>} : vector<8x16xbf16>, vector<16x128xbf16>, vector<8x128xf32> -> vector<8x128xf32>
    %158 = arith.negf %157 : vector<8x128xf32>
    %159 = math.exp %158 : vector<8x128xf32>
    %cst_61 = arith.constant 1.000000e+00 : f32
    %160 = vector.broadcast %cst_61 : f32 to vector<8x128xf32>
    %161 = arith.addf %160, %159 : vector<8x128xf32>
    %162 = arith.divf %160, %161 : vector<8x128xf32>
    %cst_62 = arith.constant 2.000000e+00 : f32
    %163 = vector.broadcast %cst_62 : f32 to vector<8x128xf32>
    %164 = arith.mulf %163, %162 : vector<8x128xf32>
    %165 = arith.mulf %164, %145 : vector<8x128xf32>
    %166 = arith.truncf %155 : vector<8x16xf32> to vector<8x16xbf16>
    %cst_63 = arith.constant dense<0.000000e+00> : vector<8x384xf32>
    %167 = tpu.matmul %166, %14, %cst_63 {dimension_numbers = #tpu.dot_dimension_numbers<[1], [0], [0], [1], [0, 0, 1, 1], [], []>} : vector<8x16xbf16>, vector<16x384xbf16>, vector<8x384xf32> -> vector<8x384xf32>
    %168 = vector.broadcast %18 : vector<1x384xf32> to vector<8x384xf32>
    %169 = arith.addf %167, %168 : vector<8x384xf32>
    %170 = arith.truncf %165 : vector<8x128xf32> to vector<8x128xbf16>
    %cst_64 = arith.constant dense<0.000000e+00> : vector<8x384xf32>
    %171 = tpu.matmul %170, %16, %cst_64 {dimension_numbers = #tpu.dot_dimension_numbers<[1], [0], [0], [1], [0, 0, 1, 1], [], []>} : vector<8x128xbf16>, vector<128x384xbf16>, vector<8x384xf32> -> vector<8x384xf32>
    %172 = vector.extract_strided_slice %169 {offsets = [0, 0], sizes = [8, 128], strides = [1, 1]} : vector<8x384xf32> to vector<8x128xf32>
    %173 = vector.extract_strided_slice %171 {offsets = [0, 0], sizes = [8, 128], strides = [1, 1]} : vector<8x384xf32> to vector<8x128xf32>
    %174 = arith.addf %172, %173 : vector<8x128xf32>
    %175 = arith.negf %174 : vector<8x128xf32>
    %176 = math.exp %175 : vector<8x128xf32>
    %cst_65 = arith.constant 1.000000e+00 : f32
    %177 = vector.broadcast %cst_65 : f32 to vector<8x128xf32>
    %178 = arith.addf %177, %176 : vector<8x128xf32>
    %179 = arith.divf %177, %178 : vector<8x128xf32>
    %180 = vector.extract_strided_slice %169 {offsets = [0, 128], sizes = [8, 128], strides = [1, 1]} : vector<8x384xf32> to vector<8x128xf32>
    %181 = vector.extract_strided_slice %171 {offsets = [0, 128], sizes = [8, 128], strides = [1, 1]} : vector<8x384xf32> to vector<8x128xf32>
    %182 = arith.addf %180, %181 : vector<8x128xf32>
    %183 = arith.negf %182 : vector<8x128xf32>
    %184 = math.exp %183 : vector<8x128xf32>
    %cst_66 = arith.constant 1.000000e+00 : f32
    %185 = vector.broadcast %cst_66 : f32 to vector<8x128xf32>
    %186 = arith.addf %185, %184 : vector<8x128xf32>
    %187 = arith.divf %185, %186 : vector<8x128xf32>
    %188 = vector.extract_strided_slice %169 {offsets = [0, 256], sizes = [8, 128], strides = [1, 1]} : vector<8x384xf32> to vector<8x128xf32>
    %189 = vector.extract_strided_slice %171 {offsets = [0, 256], sizes = [8, 128], strides = [1, 1]} : vector<8x384xf32> to vector<8x128xf32>
    %190 = vector.broadcast %20 : vector<1x128xf32> to vector<8x128xf32>
    %191 = arith.addf %189, %190 : vector<8x128xf32>
    %192 = arith.mulf %179, %191 : vector<8x128xf32>
    %193 = arith.addf %188, %192 : vector<8x128xf32>
    %194 = math.tanh %193 : vector<8x128xf32>
    %cst_67 = arith.constant 1.000000e+00 : f32
    %195 = vector.broadcast %cst_67 : f32 to vector<8x128xf32>
    %196 = arith.subf %195, %187 : vector<8x128xf32>
    %197 = arith.mulf %196, %194 : vector<8x128xf32>
    %198 = arith.mulf %187, %165 : vector<8x128xf32>
    %199 = arith.addf %197, %198 : vector<8x128xf32>
    %200 = tpu.iota {dimensions = array<i32: 0>} : vector<8x128xi32>
    %201 = vector.broadcast %122 : i32 to vector<8x128xi32>
    %202 = arith.cmpi slt, %200, %201 : vector<8x128xi32>
    %203 = arith.select %202, %199, %110 : vector<8x128xi1>, vector<8x128xf32>
    %c0_68 = arith.constant 0 : index
    %204 = arith.index_cast %119 : i32 to index
    %c0_69 = arith.constant 0 : index
    %c0_70 = arith.constant 0 : index
    %205 = vector.load %arg10[%c0_68, %204, %c0_69, %c0_70] : memref<1x4x8x128xf32, #tpu.memory_space<vmem>>, vector<1x1x8x128xf32>
    %206 = vector.shape_cast %205 : vector<1x1x8x128xf32> to vector<8x128xf32>
    %207 = vector.shape_cast %203 : vector<8x128xf32> to vector<1x1x8x128xf32>
    tpu.vector_store %arg10[%c0_68, %204, %c0_69, %c0_70], %207 {strides = array<i32>} : memref<1x4x8x128xf32, #tpu.memory_space<vmem>>, vector<1x1x8x128xf32>,
    %c2_i32_71 = arith.constant 2 : i32
    %c3_i32_72 = arith.constant 3 : i32
    %208 = arith.muli %arg0, %c3_i32_72 : i32
    %c2_i32_73 = arith.constant 2 : i32
    %209 = arith.muli %c2_i32_73, %arg0 : i32
    %c1_i32_74 = arith.constant 1 : i32
    %210 = arith.subi %c1_i32_74, %209 : i32
    %211 = arith.muli %210, %c2_i32_71 : i32
    %212 = arith.addi %208, %211 : i32
    %213 = arith.addi %8, %212 : i32
    %214 = arith.index_cast %213 : i32 to index
    %215 = memref.load %arg2[%214] : memref<12xi32, #tpu.memory_space<smem>>
    %216 = arith.index_cast %212 : i32 to index
    %c0_75 = arith.constant 0 : index
    %c0_76 = arith.constant 0 : index
    %217 = vector.load %arg3[%216, %c0_75, %c0_76] : memref<4x8x16xf32, #tpu.memory_space<vmem>>, vector<1x8x16xf32>
    %218 = vector.shape_cast %217 : vector<1x8x16xf32> to vector<8x16xf32>
    %219 = arith.truncf %203 : vector<8x128xf32> to vector<8x128xbf16>
    %cst_77 = arith.constant dense<0.000000e+00> : vector<8x16xf32>
    %220 = tpu.matmul %219, %10, %cst_77 {dimension_numbers = #tpu.dot_dimension_numbers<[1], [0], [0], [1], [0, 0, 1, 1], [], []>} : vector<8x128xbf16>, vector<128x16xbf16>, vector<8x16xf32> -> vector<8x16xf32>
    %221 = arith.negf %220 : vector<8x16xf32>
    %222 = math.exp %221 : vector<8x16xf32>
    %cst_78 = arith.constant 1.000000e+00 : f32
    %223 = vector.broadcast %cst_78 : f32 to vector<8x16xf32>
    %224 = arith.addf %223, %222 : vector<8x16xf32>
    %225 = arith.divf %223, %224 : vector<8x16xf32>
    %cst_79 = arith.constant 2.000000e+00 : f32
    %226 = vector.broadcast %cst_79 : f32 to vector<8x16xf32>
    %227 = arith.mulf %226, %225 : vector<8x16xf32>
    %228 = arith.mulf %227, %218 : vector<8x16xf32>
    %229 = arith.truncf %228 : vector<8x16xf32> to vector<8x16xbf16>
    %cst_80 = arith.constant dense<0.000000e+00> : vector<8x128xf32>
    %230 = tpu.matmul %229, %12, %cst_80 {dimension_numbers = #tpu.dot_dimension_numbers<[1], [0], [0], [1], [0, 0, 1, 1], [], []>} : vector<8x16xbf16>, vector<16x128xbf16>, vector<8x128xf32> -> vector<8x128xf32>
    %231 = arith.negf %230 : vector<8x128xf32>
    %232 = math.exp %231 : vector<8x128xf32>
    %cst_81 = arith.constant 1.000000e+00 : f32
    %233 = vector.broadcast %cst_81 : f32 to vector<8x128xf32>
    %234 = arith.addf %233, %232 : vector<8x128xf32>
    %235 = arith.divf %233, %234 : vector<8x128xf32>
    %cst_82 = arith.constant 2.000000e+00 : f32
    %236 = vector.broadcast %cst_82 : f32 to vector<8x128xf32>
    %237 = arith.mulf %236, %235 : vector<8x128xf32>
    %238 = arith.mulf %237, %203 : vector<8x128xf32>
    %239 = arith.truncf %238 : vector<8x128xf32> to vector<8x128xbf16>
    %cst_83 = arith.constant dense<0.000000e+00> : vector<8x16xf32>
    %240 = tpu.matmul %239, %10, %cst_83 {dimension_numbers = #tpu.dot_dimension_numbers<[1], [0], [0], [1], [0, 0, 1, 1], [], []>} : vector<8x128xbf16>, vector<128x16xbf16>, vector<8x16xf32> -> vector<8x16xf32>
    %241 = arith.negf %240 : vector<8x16xf32>
    %242 = math.exp %241 : vector<8x16xf32>
    %cst_84 = arith.constant 1.000000e+00 : f32
    %243 = vector.broadcast %cst_84 : f32 to vector<8x16xf32>
    %244 = arith.addf %243, %242 : vector<8x16xf32>
    %245 = arith.divf %243, %244 : vector<8x16xf32>
    %cst_85 = arith.constant 2.000000e+00 : f32
    %246 = vector.broadcast %cst_85 : f32 to vector<8x16xf32>
    %247 = arith.mulf %246, %245 : vector<8x16xf32>
    %248 = arith.mulf %247, %228 : vector<8x16xf32>
    %249 = arith.truncf %248 : vector<8x16xf32> to vector<8x16xbf16>
    %cst_86 = arith.constant dense<0.000000e+00> : vector<8x128xf32>
    %250 = tpu.matmul %249, %12, %cst_86 {dimension_numbers = #tpu.dot_dimension_numbers<[1], [0], [0], [1], [0, 0, 1, 1], [], []>} : vector<8x16xbf16>, vector<16x128xbf16>, vector<8x128xf32> -> vector<8x128xf32>
    %251 = arith.negf %250 : vector<8x128xf32>
    %252 = math.exp %251 : vector<8x128xf32>
    %cst_87 = arith.constant 1.000000e+00 : f32
    %253 = vector.broadcast %cst_87 : f32 to vector<8x128xf32>
    %254 = arith.addf %253, %252 : vector<8x128xf32>
    %255 = arith.divf %253, %254 : vector<8x128xf32>
    %cst_88 = arith.constant 2.000000e+00 : f32
    %256 = vector.broadcast %cst_88 : f32 to vector<8x128xf32>
    %257 = arith.mulf %256, %255 : vector<8x128xf32>
    %258 = arith.mulf %257, %238 : vector<8x128xf32>
    %259 = arith.truncf %248 : vector<8x16xf32> to vector<8x16xbf16>
    %cst_89 = arith.constant dense<0.000000e+00> : vector<8x384xf32>
    %260 = tpu.matmul %259, %14, %cst_89 {dimension_numbers = #tpu.dot_dimension_numbers<[1], [0], [0], [1], [0, 0, 1, 1], [], []>} : vector<8x16xbf16>, vector<16x384xbf16>, vector<8x384xf32> -> vector<8x384xf32>
    %261 = vector.broadcast %18 : vector<1x384xf32> to vector<8x384xf32>
    %262 = arith.addf %260, %261 : vector<8x384xf32>
    %263 = arith.truncf %258 : vector<8x128xf32> to vector<8x128xbf16>
    %cst_90 = arith.constant dense<0.000000e+00> : vector<8x384xf32>
    %264 = tpu.matmul %263, %16, %cst_90 {dimension_numbers = #tpu.dot_dimension_numbers<[1], [0], [0], [1], [0, 0, 1, 1], [], []>} : vector<8x128xbf16>, vector<128x384xbf16>, vector<8x384xf32> -> vector<8x384xf32>
    %265 = vector.extract_strided_slice %262 {offsets = [0, 0], sizes = [8, 128], strides = [1, 1]} : vector<8x384xf32> to vector<8x128xf32>
    %266 = vector.extract_strided_slice %264 {offsets = [0, 0], sizes = [8, 128], strides = [1, 1]} : vector<8x384xf32> to vector<8x128xf32>
    %267 = arith.addf %265, %266 : vector<8x128xf32>
    %268 = arith.negf %267 : vector<8x128xf32>
    %269 = math.exp %268 : vector<8x128xf32>
    %cst_91 = arith.constant 1.000000e+00 : f32
    %270 = vector.broadcast %cst_91 : f32 to vector<8x128xf32>
    %271 = arith.addf %270, %269 : vector<8x128xf32>
    %272 = arith.divf %270, %271 : vector<8x128xf32>
    %273 = vector.extract_strided_slice %262 {offsets = [0, 128], sizes = [8, 128], strides = [1, 1]} : vector<8x384xf32> to vector<8x128xf32>
    %274 = vector.extract_strided_slice %264 {offsets = [0, 128], sizes = [8, 128], strides = [1, 1]} : vector<8x384xf32> to vector<8x128xf32>
    %275 = arith.addf %273, %274 : vector<8x128xf32>
    %276 = arith.negf %275 : vector<8x128xf32>
    %277 = math.exp %276 : vector<8x128xf32>
    %cst_92 = arith.constant 1.000000e+00 : f32
    %278 = vector.broadcast %cst_92 : f32 to vector<8x128xf32>
    %279 = arith.addf %278, %277 : vector<8x128xf32>
    %280 = arith.divf %278, %279 : vector<8x128xf32>
    %281 = vector.extract_strided_slice %262 {offsets = [0, 256], sizes = [8, 128], strides = [1, 1]} : vector<8x384xf32> to vector<8x128xf32>
    %282 = vector.extract_strided_slice %264 {offsets = [0, 256], sizes = [8, 128], strides = [1, 1]} : vector<8x384xf32> to vector<8x128xf32>
    %283 = vector.broadcast %20 : vector<1x128xf32> to vector<8x128xf32>
    %284 = arith.addf %282, %283 : vector<8x128xf32>
    %285 = arith.mulf %272, %284 : vector<8x128xf32>
    %286 = arith.addf %281, %285 : vector<8x128xf32>
    %287 = math.tanh %286 : vector<8x128xf32>
    %cst_93 = arith.constant 1.000000e+00 : f32
    %288 = vector.broadcast %cst_93 : f32 to vector<8x128xf32>
    %289 = arith.subf %288, %280 : vector<8x128xf32>
    %290 = arith.mulf %289, %287 : vector<8x128xf32>
    %291 = arith.mulf %280, %258 : vector<8x128xf32>
    %292 = arith.addf %290, %291 : vector<8x128xf32>
    %293 = tpu.iota {dimensions = array<i32: 0>} : vector<8x128xi32>
    %294 = vector.broadcast %215 : i32 to vector<8x128xi32>
    %295 = arith.cmpi slt, %293, %294 : vector<8x128xi32>
    %296 = arith.select %295, %292, %203 : vector<8x128xi1>, vector<8x128xf32>
    %c0_94 = arith.constant 0 : index
    %297 = arith.index_cast %212 : i32 to index
    %c0_95 = arith.constant 0 : index
    %c0_96 = arith.constant 0 : index
    %298 = vector.load %arg10[%c0_94, %297, %c0_95, %c0_96] : memref<1x4x8x128xf32, #tpu.memory_space<vmem>>, vector<1x1x8x128xf32>
    %299 = vector.shape_cast %298 : vector<1x1x8x128xf32> to vector<8x128xf32>
    %300 = vector.shape_cast %296 : vector<8x128xf32> to vector<1x1x8x128xf32>
    tpu.vector_store %arg10[%c0_94, %297, %c0_95, %c0_96], %300 {strides = array<i32>} : memref<1x4x8x128xf32, #tpu.memory_space<vmem>>, vector<1x1x8x128xf32>,
    %c3_i32_97 = arith.constant 3 : i32
    %c3_i32_98 = arith.constant 3 : i32
    %301 = arith.muli %arg0, %c3_i32_98 : i32
    %c2_i32_99 = arith.constant 2 : i32
    %302 = arith.muli %c2_i32_99, %arg0 : i32
    %c1_i32_100 = arith.constant 1 : i32
    %303 = arith.subi %c1_i32_100, %302 : i32
    %304 = arith.muli %303, %c3_i32_97 : i32
    %305 = arith.addi %301, %304 : i32
    %306 = arith.addi %8, %305 : i32
    %307 = arith.index_cast %306 : i32 to index
    %308 = memref.load %arg2[%307] : memref<12xi32, #tpu.memory_space<smem>>
    %309 = arith.index_cast %305 : i32 to index
    %c0_101 = arith.constant 0 : index
    %c0_102 = arith.constant 0 : index
    %310 = vector.load %arg3[%309, %c0_101, %c0_102] : memref<4x8x16xf32, #tpu.memory_space<vmem>>, vector<1x8x16xf32>
    %311 = vector.shape_cast %310 : vector<1x8x16xf32> to vector<8x16xf32>
    %312 = arith.truncf %296 : vector<8x128xf32> to vector<8x128xbf16>
    %cst_103 = arith.constant dense<0.000000e+00> : vector<8x16xf32>
    %313 = tpu.matmul %312, %10, %cst_103 {dimension_numbers = #tpu.dot_dimension_numbers<[1], [0], [0], [1], [0, 0, 1, 1], [], []>} : vector<8x128xbf16>, vector<128x16xbf16>, vector<8x16xf32> -> vector<8x16xf32>
    %314 = arith.negf %313 : vector<8x16xf32>
    %315 = math.exp %314 : vector<8x16xf32>
    %cst_104 = arith.constant 1.000000e+00 : f32
    %316 = vector.broadcast %cst_104 : f32 to vector<8x16xf32>
    %317 = arith.addf %316, %315 : vector<8x16xf32>
    %318 = arith.divf %316, %317 : vector<8x16xf32>
    %cst_105 = arith.constant 2.000000e+00 : f32
    %319 = vector.broadcast %cst_105 : f32 to vector<8x16xf32>
    %320 = arith.mulf %319, %318 : vector<8x16xf32>
    %321 = arith.mulf %320, %311 : vector<8x16xf32>
    %322 = arith.truncf %321 : vector<8x16xf32> to vector<8x16xbf16>
    %cst_106 = arith.constant dense<0.000000e+00> : vector<8x128xf32>
    %323 = tpu.matmul %322, %12, %cst_106 {dimension_numbers = #tpu.dot_dimension_numbers<[1], [0], [0], [1], [0, 0, 1, 1], [], []>} : vector<8x16xbf16>, vector<16x128xbf16>, vector<8x128xf32> -> vector<8x128xf32>
    %324 = arith.negf %323 : vector<8x128xf32>
    %325 = math.exp %324 : vector<8x128xf32>
    %cst_107 = arith.constant 1.000000e+00 : f32
    %326 = vector.broadcast %cst_107 : f32 to vector<8x128xf32>
    %327 = arith.addf %326, %325 : vector<8x128xf32>
    %328 = arith.divf %326, %327 : vector<8x128xf32>
    %cst_108 = arith.constant 2.000000e+00 : f32
    %329 = vector.broadcast %cst_108 : f32 to vector<8x128xf32>
    %330 = arith.mulf %329, %328 : vector<8x128xf32>
    %331 = arith.mulf %330, %296 : vector<8x128xf32>
    %332 = arith.truncf %331 : vector<8x128xf32> to vector<8x128xbf16>
    %cst_109 = arith.constant dense<0.000000e+00> : vector<8x16xf32>
    %333 = tpu.matmul %332, %10, %cst_109 {dimension_numbers = #tpu.dot_dimension_numbers<[1], [0], [0], [1], [0, 0, 1, 1], [], []>} : vector<8x128xbf16>, vector<128x16xbf16>, vector<8x16xf32> -> vector<8x16xf32>
    %334 = arith.negf %333 : vector<8x16xf32>
    %335 = math.exp %334 : vector<8x16xf32>
    %cst_110 = arith.constant 1.000000e+00 : f32
    %336 = vector.broadcast %cst_110 : f32 to vector<8x16xf32>
    %337 = arith.addf %336, %335 : vector<8x16xf32>
    %338 = arith.divf %336, %337 : vector<8x16xf32>
    %cst_111 = arith.constant 2.000000e+00 : f32
    %339 = vector.broadcast %cst_111 : f32 to vector<8x16xf32>
    %340 = arith.mulf %339, %338 : vector<8x16xf32>
    %341 = arith.mulf %340, %321 : vector<8x16xf32>
    %342 = arith.truncf %341 : vector<8x16xf32> to vector<8x16xbf16>
    %cst_112 = arith.constant dense<0.000000e+00> : vector<8x128xf32>
    %343 = tpu.matmul %342, %12, %cst_112 {dimension_numbers = #tpu.dot_dimension_numbers<[1], [0], [0], [1], [0, 0, 1, 1], [], []>} : vector<8x16xbf16>, vector<16x128xbf16>, vector<8x128xf32> -> vector<8x128xf32>
    %344 = arith.negf %343 : vector<8x128xf32>
    %345 = math.exp %344 : vector<8x128xf32>
    %cst_113 = arith.constant 1.000000e+00 : f32
    %346 = vector.broadcast %cst_113 : f32 to vector<8x128xf32>
    %347 = arith.addf %346, %345 : vector<8x128xf32>
    %348 = arith.divf %346, %347 : vector<8x128xf32>
    %cst_114 = arith.constant 2.000000e+00 : f32
    %349 = vector.broadcast %cst_114 : f32 to vector<8x128xf32>
    %350 = arith.mulf %349, %348 : vector<8x128xf32>
    %351 = arith.mulf %350, %331 : vector<8x128xf32>
    %352 = arith.truncf %341 : vector<8x16xf32> to vector<8x16xbf16>
    %cst_115 = arith.constant dense<0.000000e+00> : vector<8x384xf32>
    %353 = tpu.matmul %352, %14, %cst_115 {dimension_numbers = #tpu.dot_dimension_numbers<[1], [0], [0], [1], [0, 0, 1, 1], [], []>} : vector<8x16xbf16>, vector<16x384xbf16>, vector<8x384xf32> -> vector<8x384xf32>
    %354 = vector.broadcast %18 : vector<1x384xf32> to vector<8x384xf32>
    %355 = arith.addf %353, %354 : vector<8x384xf32>
    %356 = arith.truncf %351 : vector<8x128xf32> to vector<8x128xbf16>
    %cst_116 = arith.constant dense<0.000000e+00> : vector<8x384xf32>
    %357 = tpu.matmul %356, %16, %cst_116 {dimension_numbers = #tpu.dot_dimension_numbers<[1], [0], [0], [1], [0, 0, 1, 1], [], []>} : vector<8x128xbf16>, vector<128x384xbf16>, vector<8x384xf32> -> vector<8x384xf32>
    %358 = vector.extract_strided_slice %355 {offsets = [0, 0], sizes = [8, 128], strides = [1, 1]} : vector<8x384xf32> to vector<8x128xf32>
    %359 = vector.extract_strided_slice %357 {offsets = [0, 0], sizes = [8, 128], strides = [1, 1]} : vector<8x384xf32> to vector<8x128xf32>
    %360 = arith.addf %358, %359 : vector<8x128xf32>
    %361 = arith.negf %360 : vector<8x128xf32>
    %362 = math.exp %361 : vector<8x128xf32>
    %cst_117 = arith.constant 1.000000e+00 : f32
    %363 = vector.broadcast %cst_117 : f32 to vector<8x128xf32>
    %364 = arith.addf %363, %362 : vector<8x128xf32>
    %365 = arith.divf %363, %364 : vector<8x128xf32>
    %366 = vector.extract_strided_slice %355 {offsets = [0, 128], sizes = [8, 128], strides = [1, 1]} : vector<8x384xf32> to vector<8x128xf32>
    %367 = vector.extract_strided_slice %357 {offsets = [0, 128], sizes = [8, 128], strides = [1, 1]} : vector<8x384xf32> to vector<8x128xf32>
    %368 = arith.addf %366, %367 : vector<8x128xf32>
    %369 = arith.negf %368 : vector<8x128xf32>
    %370 = math.exp %369 : vector<8x128xf32>
    %cst_118 = arith.constant 1.000000e+00 : f32
    %371 = vector.broadcast %cst_118 : f32 to vector<8x128xf32>
    %372 = arith.addf %371, %370 : vector<8x128xf32>
    %373 = arith.divf %371, %372 : vector<8x128xf32>
    %374 = vector.extract_strided_slice %355 {offsets = [0, 256], sizes = [8, 128], strides = [1, 1]} : vector<8x384xf32> to vector<8x128xf32>
    %375 = vector.extract_strided_slice %357 {offsets = [0, 256], sizes = [8, 128], strides = [1, 1]} : vector<8x384xf32> to vector<8x128xf32>
    %376 = vector.broadcast %20 : vector<1x128xf32> to vector<8x128xf32>
    %377 = arith.addf %375, %376 : vector<8x128xf32>
    %378 = arith.mulf %365, %377 : vector<8x128xf32>
    %379 = arith.addf %374, %378 : vector<8x128xf32>
    %380 = math.tanh %379 : vector<8x128xf32>
    %cst_119 = arith.constant 1.000000e+00 : f32
    %381 = vector.broadcast %cst_119 : f32 to vector<8x128xf32>
    %382 = arith.subf %381, %373 : vector<8x128xf32>
    %383 = arith.mulf %382, %380 : vector<8x128xf32>
    %384 = arith.mulf %373, %351 : vector<8x128xf32>
    %385 = arith.addf %383, %384 : vector<8x128xf32>
    %386 = tpu.iota {dimensions = array<i32: 0>} : vector<8x128xi32>
    %387 = vector.broadcast %308 : i32 to vector<8x128xi32>
    %388 = arith.cmpi slt, %386, %387 : vector<8x128xi32>
    %389 = arith.select %388, %385, %296 : vector<8x128xi1>, vector<8x128xf32>
    %c0_120 = arith.constant 0 : index
    %390 = arith.index_cast %305 : i32 to index
    %c0_121 = arith.constant 0 : index
    %c0_122 = arith.constant 0 : index
    %391 = vector.load %arg10[%c0_120, %390, %c0_121, %c0_122] : memref<1x4x8x128xf32, #tpu.memory_space<vmem>>, vector<1x1x8x128xf32>
    %392 = vector.shape_cast %391 : vector<1x1x8x128xf32> to vector<8x128xf32>
    %393 = vector.shape_cast %389 : vector<8x128xf32> to vector<1x1x8x128xf32>
    tpu.vector_store %arg10[%c0_120, %390, %c0_121, %c0_122], %393 {strides = array<i32>} : memref<1x4x8x128xf32, #tpu.memory_space<vmem>>, vector<1x1x8x128xf32>,
    %c4_i32_123 = arith.constant 4 : i32
    %c0_124 = arith.constant 0 : index
    %c0_125 = arith.constant 0 : index
    %394 = vector.load %arg11[%c0_124, %c0_125] : memref<8x128xf32, #tpu.memory_space<vmem>>, vector<8x128xf32>
    tpu.vector_store %arg11[%c0_124, %c0_125], %389 {strides = array<i32>} : memref<8x128xf32, #tpu.memory_space<vmem>>, vector<8x128xf32>,
    return
  }
  func.func @transform_0(%arg0: i32, %arg1: i32, %arg2: memref<12xi32, #tpu.memory_space<smem>>) -> (i32, i32, i32) {
    %c2_i32 = arith.constant 2 : i32
    %0 = arith.muli %arg0, %c2_i32 : i32
    %c2_i32_0 = arith.constant 2 : i32
    %1 = arith.muli %c2_i32_0, %arg0 : i32
    %c1_i32 = arith.constant 1 : i32
    %2 = arith.subi %c1_i32, %1 : i32
    %3 = arith.muli %2, %arg1 : i32
    %4 = arith.addi %0, %3 : i32
    %c0_i32 = arith.constant 0 : i32
    %c0_i32_1 = arith.constant 0 : i32
    %c0_i32_2 = arith.constant 0 : i32
    return %4, %c0_i32, %c0_i32_1 : i32, i32, i32
  }
  func.func @transform_1(%arg0: i32, %arg1: i32, %arg2: memref<12xi32, #tpu.memory_space<smem>>) -> (i32, i32, i32) {
    %c0_i32 = arith.constant 0 : i32
    %c0_i32_0 = arith.constant 0 : i32
    %c0_i32_1 = arith.constant 0 : i32
    return %arg0, %c0_i32, %c0_i32_0 : i32, i32, i32
  }
  func.func @transform_2(%arg0: i32, %arg1: i32, %arg2: memref<12xi32, #tpu.memory_space<smem>>) -> (i32, i32, i32) {
    %c0_i32 = arith.constant 0 : i32
    %c0_i32_0 = arith.constant 0 : i32
    %c0_i32_1 = arith.constant 0 : i32
    return %arg0, %c0_i32, %c0_i32_0 : i32, i32, i32
  }
  func.func @transform_3(%arg0: i32, %arg1: i32, %arg2: memref<12xi32, #tpu.memory_space<smem>>) -> (i32, i32, i32) {
    %c0_i32 = arith.constant 0 : i32
    %c0_i32_0 = arith.constant 0 : i32
    %c0_i32_1 = arith.constant 0 : i32
    return %arg0, %c0_i32, %c0_i32_0 : i32, i32, i32
  }
  func.func @transform_4(%arg0: i32, %arg1: i32, %arg2: memref<12xi32, #tpu.memory_space<smem>>) -> (i32, i32, i32) {
    %c0_i32 = arith.constant 0 : i32
    %c0_i32_0 = arith.constant 0 : i32
    %c0_i32_1 = arith.constant 0 : i32
    return %arg0, %c0_i32, %c0_i32_0 : i32, i32, i32
  }
  func.func @transform_5(%arg0: i32, %arg1: i32, %arg2: memref<12xi32, #tpu.memory_space<smem>>) -> (i32, i32, i32) {
    %c0_i32 = arith.constant 0 : i32
    %c0_i32_0 = arith.constant 0 : i32
    %c0_i32_1 = arith.constant 0 : i32
    return %arg0, %c0_i32, %c0_i32_0 : i32, i32, i32
  }
  func.func @transform_6(%arg0: i32, %arg1: i32, %arg2: memref<12xi32, #tpu.memory_space<smem>>) -> (i32, i32, i32) {
    %c0_i32 = arith.constant 0 : i32
    %c0_i32_0 = arith.constant 0 : i32
    %c0_i32_1 = arith.constant 0 : i32
    return %arg0, %c0_i32, %c0_i32_0 : i32, i32, i32
  }
  func.func @transform_7(%arg0: i32, %arg1: i32, %arg2: memref<12xi32, #tpu.memory_space<smem>>) -> (i32, i32, i32, i32) {
    %c2_i32 = arith.constant 2 : i32
    %0 = arith.muli %arg0, %c2_i32 : i32
    %c2_i32_0 = arith.constant 2 : i32
    %1 = arith.muli %c2_i32_0, %arg0 : i32
    %c1_i32 = arith.constant 1 : i32
    %2 = arith.subi %c1_i32, %1 : i32
    %3 = arith.muli %2, %arg1 : i32
    %4 = arith.addi %0, %3 : i32
    %c0_i32 = arith.constant 0 : i32
    %c0_i32_1 = arith.constant 0 : i32
    %c0_i32_2 = arith.constant 0 : i32
    return %arg0, %4, %c0_i32, %c0_i32_1 : i32, i32, i32, i32
  }
}

</mosaic_0001>

<bundles_post_ra>
// kernel: tpu_custom_call.1
= control target key start
LH: loop header
LB: loop body
LE: loop exit
PB: predicated region body
PF: predicated region fallthrough
CT: control target
= control target key end

     0   :  { %s4721_s0 = inlined_call_operand.vmem [shape: s32[12], index: 0, kind: input, shape index: {}]   ;;  %s4722_s1 = inlined_call_operand.vmem [shape: f32[12,8,16], index: 1, kind: input, shape index: {}]   ;;  %s4723_s2 = inlined_call_operand.vmem [shape: bf16[2,128,16], index: 2, kind: input, shape index: {}]   ;;  %s4724_s3 = inlined_call_operand.hbm [shape: bf16[2,16,128], index: 3, kind: input, shape index: {}]   ;;  %s4725_s4 = inlined_call_operand.vmem [shape: bf16[2,16,384], index: 4, kind: input, shape index: {}]   ;;  %s4726_s5 = inlined_call_operand.hbm [shape: bf16[2,128,384], index: 5, kind: input, shape index: {}]   ;;  %s4727_s6 = inlined_call_operand.vmem [shape: f32[2,1,384], index: 6, kind: input, shape index: {}]   ;;  %s4728_s7 = inlined_call_operand.vmem [shape: f32[2,1,128], index: 7, kind: input, shape index: {}]   ;;  %s4729_s8 = inlined_call_operand.hbm [shape: f32[2,12,8,128], index: 8, kind: output, shape index: {}]  }
   0x1   :  { %4745 = sst [smem:[#allocation27_spill]] %s4722_s1  ;;  %s13_s29 = sshll.u32 %s4721_s0, 4  ;;  %s14_s29 = int_to_ptr.vmem [resolvable:$true] %s13_s29 }
   0x2   :  { %4746 = sst [smem:[#allocation28_spill]] %s4723_s2  ;;  %s3491_s30 = scalar_lea.vmem %s14_s29, 16 }
   0x3   :  { %4747 = sst [smem:[#allocation29_spill]] %s4724_s3  ;;  %p3492_p0 = scmp.ne.s32.totalorder %s14_s29, %s3491_s30 }
   0x4   :  { %4748 = sst [smem:[#allocation30_spill]] %s4725_s4  ;;  %p3496_p1 = scmp.lt.s32.totalorder %s14_s29, %s14_s29 }
   0x5   :  { %4749 = sst [smem:[#allocation31_spill]] %s4726_s5  ;;  %p3497_p2 = scmp.lt.s32.totalorder %s3491_s30, %s3491_s30 }
   0x6   :  { %4750 = sst [smem:[#allocation32_spill]] %s4727_s6 }
   0x7   :  { %4751 = sst [smem:[#allocation33_spill]] %s4728_s7  ;;  %p3498_p3 = por %p3497_p2, %p3496_p1 }
   0x8   :  { %4752 = sst [smem:[#allocation34_spill]] %s4729_s8 }
   0x9   :  { %p3499_p4 = pnand %p3498_p3, %p3492_p0 }
   0xb   :  { %3502 = shalt.err (!%p3499_p4)  }
   0xc   :  { %s3693_s9 = smov [#allocation4]  }
   0xd   :  { %16 = dma.vmem_to_smem %s14_s29, 16, %s3693_s9, [#allocation3] }
   0xe   :  { %3635 = dma.done.wait [#allocation3], 16 }
   0xf   :  { %3636 = vsyncadd [#allocation3], 4294967280 }
  0x10   :  { %18 = sfence }
  0x11   :  { %19 = vsyncpa [#allocation6], 0 }
  0x12   :  { %21 = vsyncpa [#allocation6 + $0x1], 0 }
  0x13   :  { %22 = vsyncpa [#allocation9], 0 }
  0x14   :  { %24 = vsyncpa [#allocation9 + $0x1], 0 }
  0x15   :  { %25 = vsyncpa [#allocation7], 0 }
  0x16   :  { %27 = vsyncpa [#allocation7 + $0x1], 0  ;;  %s3755_s0 = smov 0   ;;  %s3757_s10 = smov 0  }
  0x17   :  { %s3759_s11 = smov 0   ;;  %s3761_s12 = smov 0  }
  0x18   :  { %s3763_s13 = smov 0   ;;  %s3765_s14 = smov 0  }
  0x19   :  { %s3767_s15 = smov 0   ;;  %s3769_s16 = smov 0  }
  0x1a   :  { %s3771_s17 = smov 0   ;;  %s3773_s18 = smov 0  }
  0x1b   :  { %s3775_s19 = smov 0  }
  0x1c LB: > { %4753 = sst [smem:[#allocation15_spill]] %s3651_s0  ;;  %s2599_s20 = sadd.s32 4294967295, %s3691_s19   ;;  %s3691_s19 = sphi %s3775_s19, %s33_s19   ;;  %s3687_s18 = sphi %s3773_s18, %s4797_s18   ;;  %s3683_s17 = sphi %s3771_s17, %s4796_s17   ;;  %s3679_s16 = sphi %s3769_s16, %s4795_s16   ;;  %s3675_s15 = sphi %s3767_s15, %s4794_s15   ;;  %s3671_s14 = sphi %s3765_s14, %s4793_s14   ;;  %s3667_s13 = sphi %s3763_s13, %s4792_s13   ;;  %s3663_s12 = sphi %s3761_s12, %s4791_s12   ;;  %s3659_s11 = sphi %s3759_s11, %s4790_s11   ;;  %s3655_s10 = sphi %s3757_s10, %s4799_s10   ;;  %s3651_s0 = sphi %s3755_s0, %s4798_s0  }
  0x1d   : > { %4754 = sst [smem:[#allocation16_spill]] %s3659_s11  ;;  %s42_s22 = sadd.s32 1, %s3683_s17 }
  0x1e   : > { %4755 = sst [smem:[#allocation17_spill]] %s3667_s13  ;;  %s45_s23 = sadd.s32 1, %s3687_s18 }
  0x1f   : > { %4756 = sst [smem:[#allocation18_spill]] %s3671_s14  ;;  %p43_p5 = scmp.ge.s32.totalorder %s42_s22, 3 }
  0x20   : > { %4757 = sst [smem:[#allocation19_spill]] %s3683_s17  ;;  %s112_s24 = sadd.s32 1, %s3671_s14 }
  0x21   : > { %4758 = sst [smem:[#allocation20_spill]] %s3687_s18  ;;  %p119_p6 = scmp.ne.s32.totalorder %s3671_s14, %s3667_s13 }
  0x22   : > { %4759 = sst [smem:[#allocation21_spill]] %s3691_s19  ;;  %p120_p7 = scmp.eq.s32.totalorder %s3691_s19, 0 }
  0x23   : > { %s4801_s22 = smov (%p43_p5, %s42_s22), 0  ;;  %s4803_s23 = smov (!%p43_p5, %s45_s23), %s3687_s18 }
  0x24   : > { %4760 = sst [smem:[#allocation22_spill]] %s4801_s22  ;;  %p3819_p8 = por %p120_p7, %p119_p6 }
  0x25   : > { %p125_p9 = scmp.ne.s32.totalorder %s3667_s13, %s3663_s12  ;;  %p47_p10 = scmp.ge.s32.totalorder %s4803_s23, 2 }
  0x26   : > { %p126_p11 = scmp.eq.s32.totalorder %s2599_s20, 0  ;;  %s2603_s26 = sshll.u32 %s3687_s18, 1 }
  0x27   : > { %s252_s27 = sadd.s32 1, %s3659_s11  ;;  %s4805_s23 = smov (%p47_p10, %s4803_s23), 0 }
  0x28   : > { %4762 = sst [smem:[#allocation23_spill]] %s4805_s23  ;;  %p3828_p12 = por %p126_p11, %p125_p9 }
  0x29   : > { %s240_s29 = ssub.s32 1, %s2603_s26  ;;  %s109_s30 = ssub.s32 %s3687_s18, %s4805_s23 }
  0x2a   : > { %s4763_s28 = scalar_select %p3828_p12, 1, 0 }
  0x2b   : > { %s241_s9 = smul.u32 %s3683_s17, %s240_s29  ;;  %p110_p13 = scmp.eq.s32.totalorder %s109_s30, 0 }
  0x2c   : > { %s2604_s12 = sshll.u32 %s4805_s23, 1  ;;  %p262_p0 = scmp.ne.s32.totalorder %s3659_s11, %s3655_s10 }
  0x2d   : > { %s242_s21 = sadd.s32 %s2603_s26, %s241_s9  ;;  %s244_s8 = ssub.s32 1, %s2604_s12 }
  0x2e   : > { %s3837_s6 = scalar_select %p110_p13, %s3671_s14, %s112_s24  }
  0x2f   : > { %s245_s7 = smul.u32 %s244_s8, %s4801_s22  ;;  %p263_p1 = scmp.eq.s32.totalorder %s2599_s20, 5 }
  0x30   : > { %4764 = sst [smem:[#allocation24_spill]] %s3837_s6  ;;  %p268_p2 = scmp.ne.s32.totalorder %s3655_s10, %s3651_s0 }
  0x31   : > { %s246_s4 = sadd.s32 %s2604_s12, %s245_s7  ;;  %s4765_s1 = sadd.s32 4294967294, %s3691_s19  }
  0x32   : > { %p269_p3 = scmp.eq.s32.totalorder %s4765_s1, 5  ;;  %s248_s29 = ssub.s32 %s242_s21, %s246_s4 }
  0x33   : > { %p3846_p4 = por %p263_p1, %p262_p0  ;;  %s249_s26 = sor.u32 %s248_s29, %s109_s30 }
  0x34   : > { %p3850_p5 = por %p269_p3, %p268_p2  ;;  %p250_p6 = scmp.eq.s32.totalorder %s249_s26, 0 }
  0x35   : > { %s4766_s17 = scalar_select %p3846_p4, 1, 0 }
  0x36   : > { %s4767_s9 = scalar_select %p3850_p5, 1, 0 }
  0x37   : > { %p3204_p7 = scmp.lt.s32.totalorder %s3691_s19, 6  ;;  %s3856_s8 = sand.u32 1, %s3671_s14  }
  0x38   : > { %4768 = sst [smem:[#allocation25_spill]] %s4767_s9  ;;  %s2607_s1 = sshll.u32 %s3856_s8, 3 }
  0x39   : > { %s3859_s7 = scalar_select %p250_p6, %s3659_s11, %s252_s27  }
  0x3a   : > { %s2711_s20 = sshll.u32 %s3687_s18, 7  ;;  %s4770_s3 = sld [smem:[#allocation29_spill]] }
  0x3b   : > { %4769 = sst [smem:[#allocation26_spill]] %s3859_s7  ;;  %s318_s30 = scalar_lea.vmem [#allocation5], %s2607_s1 }
  0x3c   : > { %s325_s12 = sshll.u32 %s318_s30, 4  ;;  %p3872_p9 = pnand %p3204_p7, %p3819_p8  ;;  %s3868_s12 = int_to_ptr.vmem [resolvable:$true] %s325_s12 }
  0x3d   : > { %s315_s27 = scalar_lea.sflag [#allocation6], %s3856_s8 }
  0x3e   : > { %p3505_p13 = pneg %p3872_p9 }
  0x40   : > { %s3866_s24 = scalar_lea.hbm %s4770_s3, %s2711_s20  ;;  %s3508_s25 = scalar_lea.hbm %s4770_s3, 256 }
  0x41   : > { %s3503_s26 = scalar_lea.hbm %s3866_s24, 128  ;;  %p3509_p8 = scmp.lt.u32.totalorder %s3866_s24, %s4770_s3 }
  0x42   : > { %p3504_p11 = scmp.ne.s32.totalorder %s3866_s24, %s3503_s26  ;;  %p3510_p2 = scmp.lt.u32.totalorder %s3508_s25, %s3503_s26 }
  0x43   : > { %p3512_p6 = scmp.lt.u32.totalorder %s3503_s26, %s3866_s24 }
  0x44   : > { %p3506_p0 = pnand %p3505_p13, %p3504_p11  ;;  %p3511_p3 = por %p3510_p2, %p3509_p8 }
  0x46   : > { %p3507_p1 = pneg %p3506_p0  ;;  %p3513_p7 = por %p3512_p6, %p3511_p3 }
  0x48   : > { %p3514_p10 = pnand %p3513_p7, %p3507_p1 }
  0x4a   : > { %3517 = shalt.err (!%p3514_p10)
}
  0x4b   : > { %s3518_s30 = scalar_lea.vmem %s3868_s12, 128  ;;  %s3694_s1 = smov [#allocation5]  }
  0x4c   : > { %p3519_p11 = scmp.ne.s32.totalorder %s3868_s12, %s3518_s30  ;;  %s3523_s20 = sshll.u32 %s3694_s1, 4  ;;  %s3524_s20 = int_to_ptr.vmem [resolvable:$false] %s3523_s20 }
  0x4d   : > { %s3525_s4 = scalar_lea.vmem %s3524_s20, 256  ;;  %p3526_p4 = scmp.lt.s32.totalorder %s3868_s12, %s3524_s20 }
  0x4e   : > { %p3521_p0 = pnand %p3519_p11, %p3505_p13  ;;  %p3527_p8 = scmp.lt.s32.totalorder %s3525_s4, %s3518_s30 }
  0x50   : > { %p3522_p5 = pneg %p3521_p0  ;;  %p3528_p2 = por %p3527_p8, %p3526_p4 }
  0x52   : > { %p3529_p3 = pnand %p3528_p2, %p3522_p5 }
  0x54   : > { %3532 = shalt.err (!%p3529_p3)
}
  0x55   : > { %s3695_s26 = smov 64   ;;  %s3696_s25 = smov 4  }
  0x56   : > { %3196 = dma.hbm_to_vmem [thread:$0]  (!%p3872_p9), %s3866_s24, 128, %s3868_s12, %s315_s27, %s3695_s26, %s3695_s26, %s3696_s25  }
  0x57   : > { %p375_p10 = scmp.lt.s32.totalorder %s3691_s19, 7  ;;  %s3181_s21 = smul.u32 192, %s3856_s8 }
  0x58   : > { %p4772_p4 = scmp.ge.s32.totalorder %s3691_s19, 1  ;;  %s3182_s1 = smul.u32 3072, %s3687_s18 }
  0x59   : > { %s4774_s5 = sld [smem:[#allocation31_spill]]  ;;  %s347_s23 = scalar_lea.vmem [#allocation8], %s3181_s21 }
  0x5a   : > { %p3909_p5 = pnand %p4772_p4, %p375_p10  ;;  %s354_s22 = sshll.u32 %s347_s23, 4  ;;  %s3919_s22 = int_to_ptr.vmem [resolvable:$true] %s354_s22 }
  0x5b   : > { %s344_s24 = scalar_lea.sflag [#allocation9], %s3856_s8 }
  0x5f   : > { %s3917_s3 = scalar_lea.hbm %s4774_s5, %s3182_s1  ;;  %s3538_s25 = scalar_lea.hbm %s4774_s5, 6144 }
  0x60   : > { %s3533_s12 = scalar_lea.hbm %s3917_s3, 3072  ;;  %p3539_p11 = scmp.lt.u32.totalorder %s3917_s3, %s4774_s5 }
  0x61   : > { %p3534_p1 = scmp.ne.s32.totalorder %s3917_s3, %s3533_s12  ;;  %p3540_p0 = scmp.lt.u32.totalorder %s3538_s25, %s3533_s12 }
  0x62   : > { %p3542_p2 = scmp.lt.u32.totalorder %s3533_s12, %s3917_s3 }
  0x63   : > { %p3536_p6 = pnand %p3534_p1, %p3505_p13  ;;  %p3541_p8 = por %p3540_p0, %p3539_p11 }
  0x65   : > { %p3537_p7 = pneg %p3536_p6  ;;  %p3543_p3 = por %p3542_p2, %p3541_p8 }
  0x67   : > { %p3544_p10 = pnand %p3543_p3, %p3537_p7 }
  0x69   : > { %3547 = shalt.err (!%p3544_p10)
}
  0x6a   : > { %s3548_s23 = scalar_lea.vmem %s3919_s22, 3072  ;;  %s3697_s21 = smov [#allocation8]  }
  0x6b   : > { %p3549_p4 = scmp.ne.s32.totalorder %s3919_s22, %s3548_s23  ;;  %s3553_s4 = sshll.u32 %s3697_s21, 4  ;;  %s3554_s4 = int_to_ptr.vmem [resolvable:$false] %s3553_s4 }
  0x6c   : > { %s3555_s27 = scalar_lea.vmem %s3554_s4, 6144  ;;  %p3556_p12 = scmp.lt.s32.totalorder %s3919_s22, %s3554_s4 }
  0x6d   : > { %p3551_p1 = pnand %p3549_p4, %p3505_p13  ;;  %p3557_p11 = scmp.lt.s32.totalorder %s3555_s27, %s3548_s23 }
  0x6f   : > { %p3552_p6 = pneg %p3551_p1  ;;  %p3558_p0 = por %p3557_p11, %p3556_p12 }
  0x71   : > { %p3559_p8 = pnand %p3558_p0, %p3552_p6 }
  0x73   : > { %3562 = shalt.err (!%p3559_p8)
}
  0x74   : > { %s3698_s12 = smov 192   ;;  %s3699_s26 = smov 12  }
  0x75   : > { %3199 = dma.hbm_to_vmem [thread:$0]  (!%p3872_p9), %s3917_s3, 3072, %s3919_s22, %s344_s24, %s3698_s12, %s3698_s12, %s3699_s26  }
  0x76   : > { %379 = sbr.rel (%p3909_p5) target bundleno = 5149 (0x141d), region = 48  ;;  %s381_s25 = sand.u32 (!%p3909_p5), 1, %s3667_s13  }
  0x77   : > { %s2612_s1 = sshll.u32 (!%p3909_p5), %s381_s25, 3  ;;  %s382_s20 = scalar_lea.sflag (!%p3909_p5), [#allocation6], %s381_s25 }
  0x78   : > { %s3950_s23 = scalar_lea.vmem (!%p3909_p5), [#allocation5], %s2612_s1  ;;  %p4775_p12 = scmp.ne.s32.totalorder (!%p3909_p5), %s4763_s28, 0 }
  0x7d   : > { %3638 = dma.done.wait (%p4775_p12), %s382_s20, 128  }
  0x7e   : > { %3640 = vsyncadd (%p4775_p12), %s382_s20, 4294967168  ;;  %s3183_s21 = smul.u32 192, %s381_s25  ;;  %s391_s29 = scalar_lea.sflag [#allocation9], %s381_s25 }
  0x80   : > { %s3956_s8 = scalar_lea.vmem [#allocation8], %s3183_s21 }
  0x81   : > { %3642 = dma.done.wait (%p4775_p12), %s391_s29, 3072  }
  0x82   : > { %3644 = vsyncadd (%p4775_p12), %s391_s29, 4294964224  ;;  %s4736_s3 = sand.u32 1, %s3655_s10   ;;  %s2614_s22 = sshll.u32 %s3679_s16, 1 }
  0x83   : > { %s2613_s30 = sshll.u32 %s4736_s3, 5  ;;  %s3966_s24 = ssub.s32 1, %s2614_s22 }
  0x84   : > { %s458_s4 = smul.u32 %s3675_s15, %s3966_s24  ;;  %p470_p9 = scmp.lt.s32.totalorder %s3679_s16, 1 }
  0x85   : > { %s4776_s2 = sld [smem:[#allocation28_spill]]  ;;  %s4777_s6 = sld [smem:[#allocation27_spill]] }
  0x86   : > { %s459_s27 = sadd.s32 %s2614_s22, %s458_s4  ;;  %s4779_s0 = sld [smem:[#allocation33_spill]] }
  0x87   : > { %s3971_s12 = sshll.u32 %s459_s27, 2  ;;  %s4778_s27 = sld [smem:[#allocation30_spill]] }
  0x88   : > { %p461_p13 = scmp.lt.s32.totalorder %s3971_s12, 11  ;;  %p2620_p5 = scmp.ne.s32.totalorder %s3675_s15, 0 }
  0x89   : > { %s471_s28 = scalar_select %p470_p9, %s3679_s16, 1 }
  0x8a   : > { %s462_s26 = scalar_select %p461_p13, %s3971_s12, 11 }
  0x8b   : > { %s2712_s25 = sshll.u32 %s471_s28, 6  ;;  %s3184_s1 = smul.u32 24, %s471_s28  ;;  %v3700_v0 = vmov (!%p2620_p5), 0.0  }
  0x8c   : > { %s2616_s20 = sshll.u32 %s462_s26, 3  ;;  %s3979_s3 = scalar_lea.vmem %s4776_s2, %s2712_s25  ;;  %497 = vst [vmem:[#allocation2] sm:$0xff] (!%p2620_p5), %v3700_v0 }
  0x8d   : > { %s3984_s14 = scalar_lea.vmem %s4777_s6, %s2616_s20  ;;  %s3989_s13 = scalar_lea.vmem %s4778_s27, %s3184_s1 }
  0x8e   : > { %s3185_s7 = smul.u32 3, %s471_s28  ;;  %s3994_s26 = scalar_lea.vmem %s4779_s0, %s471_s28 }
  0x8f   : > { %s4780_s25 = sld [smem:[#allocation32_spill]]  ;;  %s4001_s2 = scalar_lea.vmem [#allocation10], %s2613_s30 }
  0x90   : > { %496 = sbr.rel (%p2620_p5) target bundleno = 151 (0x97), region = 60 }
  0x95   : > { %s3999_s29 = scalar_lea.vmem %s4780_s25, %s3185_s7 }
  0x97 PF: > { %v4005_v1 = vld [vmem:[%s3979_s3] sm:$0xff]   ;;  %v3701_v2 = vmov 0.0   ;;  %v4011_v3 = vld [vmem:[%s3979_s3 + $0x8] sm:$0xff]   ;;  %vm3702_vm0 = vmmov 0   ;;  %v4020_v4 = vld [vmem:[%s3979_s3 + $0x10] sm:$0xff]   ;;  %s2623_s5 = smul.u32 24, %s3679_s16 }
  0x98   : > { %2845 = vmatprep.subr.bf16.mxu0 %v3701_v2  ;;  %2865 = vmatprep.subr.bf16.mxu1 %v3701_v2  ;;  %v4024_v5 = vld [vmem:[%s3979_s3 + $0x18] sm:$0xff]   ;;  %v4029_v6 = vld [vmem:[%s3979_s3 + $0x20] sm:$0xff]   ;;  %v4034_v7 = vld [vmem:[%s3979_s3 + $0x28] sm:$0xff]   ;;  %vm670_vm1 = vcmask 130048   ;;  %v3703_v38 = vmov 0   ;;  %s4265_s0 = smul.u32 3, %s3679_s16 }
  0x99   : > { %2846 = vmatpush3.bf16.msra.mxu0 %v4005_v1  ;;  %2861 = vmatprep.mubr.msk.bf16.mxu0 %vm3702_vm0, %v3701_v2  ;;  %v4040_v8 = vld [vmem:[%s3979_s3 + $0x30] sm:$0xff]   ;;  %v4045_v9 = vld [vmem:[%s3979_s3 + $0x38] sm:$0xff]   ;;  %v4047_v10 = vld [vmem:[#allocation2] sm:$0xff]  ;;  %s564_s6 = scalar_lea.vmem %s3984_s14, %s2623_s5  ;;  %s1179_s18 = scalar_lea.vmem %s4001_s2, %s2623_s5 [#allocation10] }
  0x9a   : > { %2847 = vmatprep.subr.bf16.mxu0 %v3701_v2  ;;  %2867 = vmatprep.mubr.msk.bf16.mxu1 %vm3702_vm0, %v3701_v2  ;;  %v566_v11 = vpack.c.bf16 %v4047_v10, %v4047_v10  ;;  %v4057_v12 = vld [vmem:[%s3950_s23] sm:$0xff]   ;;  %v565_v21 = vld [vmem:[%s564_s6] sm:$0xff]  ;;  %s561_s11 = sadd.s32 %s3971_s12, %s4265_s0  ;;  %s4288_s19 = sadd.s32 %s4265_s0, %s3966_s24 }
  0x9b   : > { %2866 = vmatpush3.bf16.msra.mxu1 %v4057_v12  ;;  %v4091_v36 = vld [vmem:[%s3989_s13 + $0x4] ss:$12 sps:$4 sm:$0xff]   ;;  %v4094_v37 = vld [vmem:[%s3989_s13] ss:$12 sps:$4 sm:$0xff]   ;;  %v4100_v49 = vld [vmem:[%s3989_s13 + $0x8] ss:$12 sps:$4 sm:$0xff]   ;;  %s1182_s30 = sadd.s32 %s3971_s12, %s4288_s19 }
  0x9c   : > { %2871 = vmatprep.subr.bf16.mxu1 %v3701_v2  ;;  %v4113_v51 = vld [vmem:[%s3956_s8 + $0x4] ss:$12 sps:$4 sm:$0xff]   ;;  %v4116_v52 = vld [vmem:[%s3956_s8] ss:$12 sps:$4 sm:$0xff]   ;;  %v4119_v53 = vld [vmem:[%s3956_s8 + $0x8] ss:$12 sps:$4 sm:$0xff]  }
  0x9d   : > { %2848 = vmatpush3.bf16.msra.mxu0 %v4011_v3  ;;  %v4125_v54 = vld [vmem:[%s3956_s8 + $0x1c] ss:$12 sps:$4 sm:$0xff]   ;;  %v4129_v55 = vld [vmem:[%s3956_s8 + $0x18] ss:$12 sps:$4 sm:$0xff]   ;;  %v4132_v56 = vld [vmem:[%s3956_s8 + $0x20] ss:$12 sps:$4 sm:$0xff]  }
  0x9e   : > { %2849 = vmatprep.subr.bf16.mxu0 %v3701_v2  ;;  %v4138_v57 = vld [vmem:[%s3956_s8 + $0x34] ss:$12 sps:$4 sm:$0xff]   ;;  %v4142_v58 = vld [vmem:[%s3956_s8 + $0x30] ss:$12 sps:$4 sm:$0xff]   ;;  %v4145_v59 = vld [vmem:[%s3956_s8 + $0x38] ss:$12 sps:$4 sm:$0xff]  }
  0x9f   : > { %v4151_v60 = vld [vmem:[%s3956_s8 + $0x4c] ss:$12 sps:$4 sm:$0xff]   ;;  %v4155_v61 = vld [vmem:[%s3956_s8 + $0x48] ss:$12 sps:$4 sm:$0xff]   ;;  %v4158_v62 = vld [vmem:[%s3956_s8 + $0x50] ss:$12 sps:$4 sm:$0xff]  }
  0xa0   : > { %v4164_v63 = vld [vmem:[%s3956_s8 + $0x64] ss:$12 sps:$4 sm:$0xff]   ;;  %v4168_v0 = vld [vmem:[%s3956_s8 + $0x60] ss:$12 sps:$4 sm:$0xff]   ;;  %s562_s15 = sld [smem:[#allocation4 + %s561_s11]]  ;;  %s2671_s9 = sshll.u32 %s4288_s19, 3 }
  0xa1   : > { %2850 = vmatpush3.bf16.msra.mxu0 %v4020_v4  ;;  %s1185_s7 = scalar_lea.vmem %s3984_s14, %s2671_s9  ;;  %s1183_s28 = sld [smem:[#allocation4 + %s1182_s30]] }
  0xa2   : > { %2851 = vmatprep.subr.bf16.mxu0 %v3701_v2  ;;  %s1577_s1 = scalar_lea.vmem %s4001_s2, %s2671_s9 [#allocation10]  ;;  %s2682_s20 = sshll.u32 %s3966_s24, 1 }
  0xa3   : > { %s4408_s22 = sadd.s32 %s2682_s20, %s4265_s0  ;;  %s1978_s25 = smul.u32 3, %s3966_s24 }
  0xa4   : > { %s2683_s4 = sshll.u32 %s4408_s22, 3  ;;  %s4781_s19 = sld [smem:[#allocation34_spill]] }
  0xa5   : > { %2852 = vmatpush3.bf16.msra.mxu0 %v4024_v5  ;;  %s1584_s27 = scalar_lea.vmem %s3984_s14, %s2683_s4  ;;  %s1976_s21 = scalar_lea.vmem %s4001_s2, %s2683_s4 [#allocation10] }
  0xa6   : > { %2853 = vmatprep.subr.bf16.mxu0 %v3701_v2  ;;  %p4784_p2 = scmp.ne.s32.totalorder %s4766_s17, 0 }
  0xa9   : > { %2854 = vmatpush3.bf16.msra.mxu0 %v4029_v6 }
  0xaa   : > { %2855 = vmatprep.subr.bf16.mxu0 %v3701_v2  ;;  %s4782_s9 = smov %s4781_s19 }
  0xad   : > { %2856 = vmatpush3.bf16.msra.mxu0 %v4034_v7 }
  0xae   : > { %2857 = vmatprep.subr.bf16.mxu0 %v3701_v2 }
  0xb1   : > { %2858 = vmatpush3.bf16.msra.mxu0 %v4040_v8 }
  0xb2   : > { %2859 = vmatprep.subr.bf16.mxu0 %v3701_v2 }
  0xb5   : > { %2860 = vmatpush3.bf16.msra.mxu0 %v4045_v9 }
  0xb6   : > { %2891 = vmatprep.subr.bf16.mxu0 %v3701_v2 }
  0xb8   : > { %2862 = vmatmul.mubr.bf16.vlgmr.msra.gmra.mrb[0].mxu0 %v566_v11  ;;  %v4171_v11 = vld [vmem:[%s3956_s8 + $0x68] ss:$12 sps:$4 sm:$0xff]  }
  0xb9   : > { %2893 = vmatprep.mubr.msk.bf16.mxu0 %vm3702_vm0, %v3701_v2  ;;  %2892 = vmatpush3.bf16.msra.mxu0 %v4057_v12 }
  0xba   : > { %2897 = vmatprep.subr.bf16.mxu0 %v3701_v2 }
 0x18b   : > { %v649_v13 = vpop.f32.mrb[0].mxu0 }
 0x18c   : > { %v2632_v14 = vmul.f32 -1.442695, %v649_v13  ;;  %v2863_v15 = vpop.f32.mrb[1].mxu0  ;;  %v4177_v13 = vld [vmem:[%s3956_s8 + $0x7c] ss:$12 sps:$4 sm:$0xff]  }
 0x18d   : > { %v652_v16 = vpop.f32.mrb[2].mxu0  ;;  %v4184_v15 = vld [vmem:[%s3956_s8 + $0x80] ss:$12 sps:$4 sm:$0xff]  }
 0x18e   : > { %3350 = vpow2.f32 %v2632_v14  ;;  %v2864_v17 = vpop.f32.mrb[3].mxu0  ;;  %v4181_v14 = vld [vmem:[%s3956_s8 + $0x78] ss:$12 sps:$4 sm:$0xff]   ;;  %v4190_v16 = vld [vmem:[%s3956_s8 + $0x94] ss:$12 sps:$4 sm:$0xff]  }
 0x18f   : > { %v4194_v17 = vld [vmem:[%s3956_s8 + $0x90] ss:$12 sps:$4 sm:$0xff]  }
 0x198   : > { %v3351_v18 = vpop.eup %3350 }
 0x199   : > { %v658_v19 = vadd.f32 1.0, %v3351_v18  ;;  %v4197_v18 = vld [vmem:[%s3956_s8 + $0x98] ss:$12 sps:$4 sm:$0xff]  }
 0x19b   : > { %3352 = vrcp.f32 %v658_v19  ;;  %v4203_v19 = vld [vmem:[%s3956_s8 + $0xac] ss:$12 sps:$4 sm:$0xff]  }
 0x1a5   : > { %v3353_v20 = vpop.eup %3352 }
 0x1a6   : > { %v661_v22 = vmul.f32 2.0, %v3353_v20  ;;  %v4207_v20 = vld [vmem:[%s3956_s8 + $0xa8] ss:$12 sps:$4 sm:$0xff]  }
 0x1a8   : > { %v662_v23 = vmul.f32 %v661_v22, %v565_v21  ;;  %v4210_v21 = vld [vmem:[%s3956_s8 + $0xb0] ss:$12 sps:$4 sm:$0xff]  }
 0x1aa   : > { %v663_v24 = vpack.c.bf16 %v662_v23, %v662_v23 }
 0x1ac   : > { %2868 = vmatmul.mubr.msk.bf16.vlgmr.msra.gmra.mrb[0].mxu1 %vm670_vm1, %v663_v24 }
 0x1ad   : > { %2872 = vmatpush3.bf16.msra.mxu1 %v4005_v1  ;;  %2887 = vmatprep.mubr.msk.bf16.mxu1 %vm3702_vm0, %v3701_v2 }
 0x1ae   : > { %2873 = vmatprep.subr.bf16.mxu1 %v3701_v2 }
 0x1b1   : > { %2874 = vmatpush3.bf16.msra.mxu1 %v4011_v3 }
 0x1b2   : > { %2875 = vmatprep.subr.bf16.mxu1 %v3701_v2 }
 0x1b5   : > { %2876 = vmatpush3.bf16.msra.mxu1 %v4020_v4 }
 0x1b6   : > { %2877 = vmatprep.subr.bf16.mxu1 %v3701_v2 }
 0x1b9   : > { %2878 = vmatpush3.bf16.msra.mxu1 %v4024_v5 }
 0x1ba   : > { %2879 = vmatprep.subr.bf16.mxu1 %v3701_v2 }
 0x1bd   : > { %2880 = vmatpush3.bf16.msra.mxu1 %v4029_v6 }
 0x1be   : > { %2881 = vmatprep.subr.bf16.mxu1 %v3701_v2 }
 0x1c1   : > { %2882 = vmatpush3.bf16.msra.mxu1 %v4034_v7 }
 0x1c2   : > { %2883 = vmatprep.subr.bf16.mxu1 %v3701_v2 }
 0x1c5   : > { %2884 = vmatpush3.bf16.msra.mxu1 %v4040_v8 }
 0x1c6   : > { %2885 = vmatprep.subr.bf16.mxu1 %v3701_v2 }
 0x1c9   : > { %2886 = vmatpush3.bf16.msra.mxu1 %v4045_v9 }
 0x1ca   : > { %855 = vmatprep.subr.bf16.mxu1 %v4091_v36 }
 0x27f   : > { %v708_v25 = vpop.f32.mrb[0].mxu1 }
 0x280   : > { %v2635_v26 = vmul.f32 -1.442695, %v708_v25  ;;  %v2869_v27 = vpop.f32.mrb[1].mxu1 }
 0x281   : > { %v711_v28 = vpop.f32.mrb[2].mxu1 }
 0x282   : > { %3354 = vpow2.f32 %v2635_v26  ;;  %v2870_v29 = vpop.f32.mrb[3].mxu1 }
 0x28c   : > { %v3355_v30 = vpop.eup %3354 }
 0x28d   : > { %v717_v31 = vadd.f32 1.0, %v3355_v30 }
 0x28f   : > { %3356 = vrcp.f32 %v717_v31 }
 0x299   : > { %v3357_v32 = vpop.eup %3356 }
 0x29a   : > { %v720_v33 = vmul.f32 2.0, %v3357_v32 }
 0x29c   : > { %v4086_v34 = vmul.f32 %v720_v33, %v4047_v10 }
 0x29e   : > { %v722_v35 = vpack.c.bf16 %v4086_v34, %v4086_v34 }
 0x2a0   : > { %2888 = vmatmul.mubr.bf16.vlgmr.msra.gmra.mrb[4].mxu1 %v722_v35 }
 0x2a1   : > { %856 = vmatpush1.bf16.msra.mxu1 %v4094_v37  ;;  %887 = vmatprep.mubr.bf16.mxu1 %v3703_v38 }
 0x2a2   : > { %1065 = vmatprep.subr.bf16.mxu1 %v4113_v51 }
 0x373   : > { %v757_v39 = vpop.f32.mrb[4].mxu1 }
 0x374   : > { %v2636_v40 = vmul.f32 -1.442695, %v757_v39  ;;  %v2889_v41 = vpop.f32.mrb[5].mxu1 }
 0x375   : > { %v760_v42 = vpop.f32.mrb[6].mxu1 }
 0x376   : > { %3358 = vpow2.f32 %v2636_v40  ;;  %v2890_v43 = vpop.f32.mrb[7].mxu1 }
 0x377   : > { %v557_v43 = vld [vmem:[%s3999_s29] sm:$0x7]  ;;  %s4563_s29 = sadd.s32 %s1978_s25, %s4265_s0  ;;  %s2398_s0 = sshll.u32 %s4001_s2, 4  ;;  %s4655_s0 = int_to_ptr.vmem [resolvable:$true] %s2398_s0 }
 0x378   : > { %s2694_s5 = sshll.u32 %s4563_s29, 3  ;;  %s3563_s30 = scalar_lea.vmem %s4655_s0, 512 }
 0x379   : > { %s1983_s6 = scalar_lea.vmem %s3984_s14, %s2694_s5  ;;  %s2375_s11 = scalar_lea.vmem %s4001_s2, %s2694_s5 [#allocation10] }
 0x37a   : > { %p3564_p7 = scmp.ne.s32.totalorder %s4655_s0, %s3563_s30  ;;  %s3704_s2 = smov [#allocation10]  }
 0x37c   : > { %p3565_p3 = pnand %p3564_p7, %p4784_p2 }
 0x37e   : > { %p3566_p10 = pneg %p3565_p3 }
 0x380   : > { %v3359_v44 = vpop.eup %3358 }
 0x381   : > { %v766_v45 = vadd.f32 1.0, %v3359_v44 }
 0x383   : > { %3360 = vrcp.f32 %v766_v45 }
 0x38d   : > { %v3361_v46 = vpop.eup %3360 }
 0x38e   : > { %v769_v47 = vmul.f32 2.0, %v3361_v46 }
 0x390   : > { %v770_v48 = vmul.f32 %v769_v47, %v662_v23 }
 0x392   : > { %v771_v50 = vpack.c.bf16 %v770_v48, %v770_v48 }
 0x394   : > { %2894 = vmatmul.mubr.msk.bf16.vlgmr.msra.gmra.mrb[4].mxu0 %vm670_vm1, %v771_v50  ;;  %2642 = vmatmul.mubr.msk.bf16.vlgmr.msra.gmra.mrb[8].mxu1 %vm670_vm1, %v771_v50 }
 0x395   : > { %2898 = vmatpush3.bf16.msra.mxu0 %v4100_v49  ;;  %2899 = vmatprep.mubr.msk.bf16.mxu0 %vm3702_vm0, %v3701_v2 }
 0x396   : > { %2903 = vmatprep.subr.bf16.mxu0 %v3701_v2  ;;  %1097 = vmatprep.mubr.bf16.mxu1 %v3703_v38 }
 0x397   : > { %1066 = vmatpush1.bf16.msra.mxu1 %v4116_v52 }
 0x398   : > { %1067 = vmatprep.subr.bf16.mxu1 %v4125_v54 }
 0x39b   : > { %1068 = vmatpush1.bf16.msra.mxu1 %v4129_v55 }
 0x39c   : > { %2900 = vmatmul.mubr.msk.bf16.vlgmr.msra.gmra.mrb[8].mxu0 %vm670_vm1, %v771_v50  ;;  %1069 = vmatprep.subr.bf16.mxu1 %v4138_v57 }
 0x39d   : > { %2919 = vmatprep.mubr.msk.bf16.mxu0 %vm3702_vm0, %v3701_v2  ;;  %2904 = vmatpush3.bf16.msra.mxu0 %v4119_v53 }
 0x39e   : > { %2905 = vmatprep.subr.bf16.mxu0 %v3701_v2 }
 0x39f   : > { %1070 = vmatpush1.bf16.msra.mxu1 %v4142_v58 }
 0x3a0   : > { %1071 = vmatprep.subr.bf16.mxu1 %v4151_v60 }
 0x3a1   : > { %2906 = vmatpush3.bf16.msra.mxu0 %v4132_v56 }
 0x3a2   : > { %2907 = vmatprep.subr.bf16.mxu0 %v3701_v2 }
 0x3a3   : > { %1072 = vmatpush1.bf16.msra.mxu1 %v4155_v61 }
 0x3a4   : > { %1073 = vmatprep.subr.bf16.mxu1 %v4164_v63 }
 0x3a5   : > { %2908 = vmatpush3.bf16.msra.mxu0 %v4145_v59 }
 0x3a6   : > { %2909 = vmatprep.subr.bf16.mxu0 %v3701_v2 }
 0x3a7   : > { %1074 = vmatpush1.bf16.msra.mxu1 %v4168_v0 }
 0x3a8   : > { %1075 = vmatprep.subr.bf16.mxu1 %v4177_v13 }
 0x3a9   : > { %2910 = vmatpush3.bf16.msra.mxu0 %v4158_v62 }
 0x3aa   : > { %2911 = vmatprep.subr.bf16.mxu0 %v3701_v2 }
 0x3ab   : > { %1076 = vmatpush1.bf16.msra.mxu1 %v4181_v14 }
 0x3ac   : > { %1077 = vmatprep.subr.bf16.mxu1 %v4190_v16 }
 0x3ad   : > { %2912 = vmatpush3.bf16.msra.mxu0 %v4171_v11 }
 0x3ae   : > { %2913 = vmatprep.subr.bf16.mxu0 %v3701_v2 }
 0x3af   : > { %1078 = vmatpush1.bf16.msra.mxu1 %v4194_v17 }
 0x3b0   : > { %1079 = vmatprep.subr.bf16.mxu1 %v4203_v19 }
 0x3b1   : > { %2914 = vmatpush3.bf16.msra.mxu0 %v4184_v15 }
 0x3b2   : > { %2915 = vmatprep.subr.bf16.mxu0 %v3701_v2 }
 0x3b3   : > { %1080 = vmatpush1.bf16.msra.mxu1 %v4207_v20 }
 0x3b4   : > { %2923 = vmatprep.subr.bf16.mxu1 %v3701_v2 }
 0x3b5   : > { %2916 = vmatpush3.bf16.msra.mxu0 %v4197_v18 }
 0x3b6   : > { %2917 = vmatprep.subr.bf16.mxu0 %v3701_v2 }
 0x3b9   : > { %2918 = vmatpush3.bf16.msra.mxu0 %v4210_v21 }
 0x3ba   : > { %2943 = vmatprep.subr.bf16.mxu0 %v3701_v2 }
 0x467   : > { %v809_v22 = vpop.f32.mrb[4].mxu0 }
 0x468   : > { %v2638_v23 = vmul.f32 -1.442695, %v809_v22  ;;  %v2895_v24 = vpop.f32.mrb[5].mxu0 }
 0x469   : > { %v812_v25 = vpop.f32.mrb[6].mxu0 }
 0x46a   : > { %3362 = vpow2.f32 %v2638_v23  ;;  %v2896_v26 = vpop.f32.mrb[7].mxu0 }
 0x46f   : > { %v4217_v27 = vpop.f32.mrb[8].mxu0 }
 0x470   : > { %v2901_v28 = vpop.f32.mrb[9].mxu0 }
 0x471   : > { %v933_v29 = vpop.f32.mrb[10].mxu0 }
 0x472   : > { %v2902_v30 = vpop.f32.mrb[11].mxu0 }
 0x474   : > { %v3363_v31 = vpop.eup %3362 }
 0x475   : > { %v818_v32 = vadd.f32 1.0, %v3363_v31 }
 0x477   : > { %3364 = vrcp.f32 %v818_v32 }
 0x481   : > { %v3365_v33 = vpop.eup %3364 }
 0x482   : > { %v821_v35 = vmul.f32 2.0, %v3365_v33 }
 0x484   : > { %v4220_v39 = vmul.f32 %v821_v35, %v4086_v34  ;;  %v824_v34 = vlaneseq }
 0x486   : > { %v936_v40 = vpack.c.bf16 %v4220_v39, %v4220_v39  ;;  %v4246_v41 = vshrl.u32 %v824_v34, 7  ;;  %v4259_v34 = vld [vmem:[%s3994_s26] ss:$0 sm:$0xff] }
 0x488   : > { %1098 = vmatmul.mubr.bf16.vlgmr.msra.gmra.mrb[8].mxu1 %v936_v40  ;;  %2920 = vmatmul.mubr.bf16.vlgmr.msra.gmra.mrb[12].mxu0 %v936_v40  ;;  %v826_v42 = vsub.s32 0, %v4246_v41  ;;  %v830_v44 = vsub.s32 1, %v4246_v41  ;;  %v834_v35 = vsub.s32 2, %v4246_v41 }
 0x489   : > { %2924 = vmatpush3.bf16.msra.mxu1 %v4005_v1  ;;  %2939 = vmatprep.mubr.msk.bf16.mxu1 %vm3702_vm0, %v3701_v2 }
 0x48a   : > { %2925 = vmatprep.subr.bf16.mxu1 %v3701_v2  ;;  %2944 = vmatpush3.bf16.msra.mxu0 %v4057_v12  ;;  %v4251_v45 = vrot.slane %v557_v43, %v826_v42  ;;  %v4253_v48 = vrot.slane %v557_v43, %v830_v44  ;;  %v4261_v42 = vrot.slane %v557_v43, %v834_v35 }
 0x48b   : > { %2945 = vmatprep.mubr.msk.bf16.mxu0 %vm3702_vm0, %v3701_v2  ;;  %2949 = vmatprep.subr.bf16.mxu0 %v3701_v2 }
 0x48d   : > { %2926 = vmatpush3.bf16.msra.mxu1 %v4011_v3 }
 0x48e   : > { %2927 = vmatprep.subr.bf16.mxu1 %v3701_v2 }
 0x491   : > { %2928 = vmatpush3.bf16.msra.mxu1 %v4020_v4 }
 0x492   : > { %2929 = vmatprep.subr.bf16.mxu1 %v3701_v2 }
 0x495   : > { %2930 = vmatpush3.bf16.msra.mxu1 %v4024_v5 }
 0x496   : > { %2931 = vmatprep.subr.bf16.mxu1 %v3701_v2 }
 0x499   : > { %2932 = vmatpush3.bf16.msra.mxu1 %v4029_v6 }
 0x49a   : > { %2933 = vmatprep.subr.bf16.mxu1 %v3701_v2 }
 0x49d   : > { %2934 = vmatpush3.bf16.msra.mxu1 %v4034_v7 }
 0x49e   : > { %2935 = vmatprep.subr.bf16.mxu1 %v3701_v2 }
 0x4a1   : > { %2936 = vmatpush3.bf16.msra.mxu1 %v4040_v8 }
 0x4a2   : > { %2937 = vmatprep.subr.bf16.mxu1 %v3701_v2 }
 0x4a5   : > { %2938 = vmatpush3.bf16.msra.mxu1 %v4045_v9 }
 0x4a6   : > { %2969 = vmatprep.subr.bf16.mxu1 %v3701_v2 }
 0x55b   : > { %v1099_v46 = vpop.f32.mrb[8].mxu1  ;;  %v1140_v47 = vpop.f32.mrb[12].mxu0 }
 0x55c   : > { %v3157_v50 = vadd.f32 %v1099_v46, %v4251_v45  ;;  %v1101_v22 = vpop.f32.mrb[9].mxu1  ;;  %v2921_v23 = vpop.f32.mrb[13].mxu0  ;;  %v1166_v46 = vadd.f32 %v4259_v34, %v1140_v47 }
 0x55d   : > { %v1103_v24 = vpop.f32.mrb[10].mxu1  ;;  %v1143_v25 = vpop.f32.mrb[14].mxu0  ;;  %v3158_v30 = vadd.f32 %v1101_v22, %v4253_v48  ;;  %v931_v22 = vadd.f32 %v4217_v27, %v4261_v42 }
 0x55e   : > { %v2668_v26 = vmul.f32 -1.442695, %v3157_v50  ;;  %v1104_v28 = vpop.f32.mrb[11].mxu1  ;;  %v2922_v29 = vpop.f32.mrb[15].mxu0 }
 0x55f   : > { %v2669_v31 = vmul.f32 -1.442695, %v3158_v30 }
 0x560   : > { %3366 = vpow2.f32 %v2668_v26  ;;  %v1176_v26 = vstv %s562_s15 }
 0x561   : > { %3368 = vpow2.f32 %v2669_v31  ;;  %vm1177_vm2 = vcmp.lt.s32.totalorder %v4246_v41, %v1176_v26 }
 0x56a   : > { %v3367_v32 = vpop.eup %3366 }
 0x56b   : > { %v1150_v33 = vadd.f32 1.0, %v3367_v32  ;;  %v3369_v40 = vpop.eup %3368 }
 0x56c   : > { %v1157_v44 = vadd.f32 1.0, %v3369_v40 }
 0x56d   : > { %3370 = vrcp.f32 %v1150_v33 }
 0x56e   : > { %3372 = vrcp.f32 %v1157_v44 }
 0x577   : > { %v3371_v50 = vpop.eup %3370 }
 0x578   : > { %v1167_v23 = vmul.f32 %v3371_v50, %v1166_v46  ;;  %v3373_v43 = vpop.eup %3372  ;;  %v1186_v50 = vld [vmem:[%s1185_s7] sm:$0xff] }
 0x579   : > { %v1170_v25 = vsub.f32 1.0, %v3373_v43  ;;  %v1172_v29 = vmul.f32 %v3373_v43, %v4220_v39 }
 0x57a   : > { %v1168_v24 = vadd.f32 %v1167_v23, %v931_v22 }
 0x57c   : > { %3374 = vtanh.f32 %v1168_v24 }
 0x586   : > { %v3375_v28 = vpop.eup %3374 }
 0x587   : > { %v1171_v47 = vmul.f32 %v3375_v28, %v1170_v25 }
 0x589   : > { %v1173_v30 = vadd.f32 %v1172_v29, %v1171_v47 }
 0x58b   : > { %v4277_v27 = vsel %vm1177_vm2, %v1173_v30, %v4047_v10 }
 0x58c   : > { %1180 = vst [vmem:[%s1179_s18] sm:$0xff] %v4277_v27  ;;  %v1187_v31 = vpack.c.bf16 %v4277_v27, %v4277_v27 }
 0x58e   : > { %2940 = vmatmul.mubr.bf16.vlgmr.msra.gmra.mrb[12].mxu1 %v1187_v31 }
 0x58f   : > { %2970 = vmatpush3.bf16.msra.mxu1 %v4057_v12  ;;  %2971 = vmatprep.mubr.msk.bf16.mxu1 %vm3702_vm0, %v3701_v2 }
 0x590   : > { %1389 = vmatprep.subr.bf16.mxu1 %v4091_v36 }
 0x661   : > { %v1222_v39 = vpop.f32.mrb[12].mxu1 }
 0x662   : > { %v2672_v32 = vmul.f32 -1.442695, %v1222_v39  ;;  %v2941_v10 = vpop.f32.mrb[13].mxu1 }
 0x663   : > { %v1225_v33 = vpop.f32.mrb[14].mxu1 }
 0x664   : > { %3376 = vpow2.f32 %v2672_v32  ;;  %v2942_v35 = vpop.f32.mrb[15].mxu1 }
 0x66e   : > { %v3377_v40 = vpop.eup %3376 }
 0x66f   : > { %v1231_v44 = vadd.f32 1.0, %v3377_v40 }
 0x671   : > { %3378 = vrcp.f32 %v1231_v44 }
 0x67b   : > { %v3379_v46 = vpop.eup %3378 }
 0x67c   : > { %v1234_v22 = vmul.f32 2.0, %v3379_v46 }
 0x67e   : > { %v1235_v23 = vmul.f32 %v1234_v22, %v1186_v50 }
 0x680   : > { %v1236_v24 = vpack.c.bf16 %v1235_v23, %v1235_v23 }
 0x682   : > { %2946 = vmatmul.mubr.msk.bf16.vlgmr.msra.gmra.mrb[16].mxu0 %vm670_vm1, %v1236_v24 }
 0x683   : > { %2950 = vmatpush3.bf16.msra.mxu0 %v4005_v1  ;;  %2965 = vmatprep.mubr.msk.bf16.mxu0 %vm3702_vm0, %v3701_v2 }
 0x684   : > { %2951 = vmatprep.subr.bf16.mxu0 %v3701_v2 }
 0x687   : > { %2952 = vmatpush3.bf16.msra.mxu0 %v4011_v3 }
 0x688   : > { %2953 = vmatprep.subr.bf16.mxu0 %v3701_v2 }
 0x68b   : > { %2954 = vmatpush3.bf16.msra.mxu0 %v4020_v4 }
 0x68c   : > { %2955 = vmatprep.subr.bf16.mxu0 %v3701_v2 }
 0x68f   : > { %2956 = vmatpush3.bf16.msra.mxu0 %v4024_v5 }
 0x690   : > { %2957 = vmatprep.subr.bf16.mxu0 %v3701_v2 }
 0x693   : > { %2958 = vmatpush3.bf16.msra.mxu0 %v4029_v6 }
 0x694   : > { %2959 = vmatprep.subr.bf16.mxu0 %v3701_v2 }
 0x697   : > { %2960 = vmatpush3.bf16.msra.mxu0 %v4034_v7 }
 0x698   : > { %2961 = vmatprep.subr.bf16.mxu0 %v3701_v2 }
 0x69b   : > { %2962 = vmatpush3.bf16.msra.mxu0 %v4040_v8 }
 0x69c   : > { %2963 = vmatprep.subr.bf16.mxu0 %v3701_v2 }
 0x69f   : > { %2964 = vmatpush3.bf16.msra.mxu0 %v4045_v9 }
 0x6a0   : > { %2975 = vmatprep.subr.bf16.mxu0 %v3701_v2 }
 0x755   : > { %v1274_v43 = vpop.f32.mrb[16].mxu0 }
 0x756   : > { %v2674_v25 = vmul.f32 -1.442695, %v1274_v43  ;;  %v2947_v26 = vpop.f32.mrb[17].mxu0 }
 0x757   : > { %v1277_v28 = vpop.f32.mrb[18].mxu0 }
 0x758   : > { %3380 = vpow2.f32 %v2674_v25  ;;  %v2948_v47 = vpop.f32.mrb[19].mxu0 }
 0x762   : > { %v3381_v29 = vpop.eup %3380 }
 0x763   : > { %v1283_v30 = vadd.f32 1.0, %v3381_v29 }
 0x765   : > { %3382 = vrcp.f32 %v1283_v30 }
 0x76f   : > { %v3383_v31 = vpop.eup %3382 }
 0x770   : > { %v1286_v39 = vmul.f32 2.0, %v3383_v31 }
 0x772   : > { %v4314_v32 = vmul.f32 %v1286_v39, %v4277_v27 }
 0x774   : > { %v1288_v10 = vpack.c.bf16 %v4314_v32, %v4314_v32 }
 0x776   : > { %2966 = vmatmul.mubr.bf16.vlgmr.msra.gmra.mrb[20].mxu0 %v1288_v10 }
 0x777   : > { %2976 = vmatpush3.bf16.msra.mxu0 %v4100_v49  ;;  %2977 = vmatprep.mubr.msk.bf16.mxu0 %vm3702_vm0, %v3701_v2 }
 0x778   : > { %2981 = vmatprep.subr.bf16.mxu0 %v3701_v2 }
 0x849   : > { %v1323_v33 = vpop.f32.mrb[20].mxu0 }
 0x84a   : > { %v2675_v35 = vmul.f32 -1.442695, %v1323_v33  ;;  %v2967_v40 = vpop.f32.mrb[21].mxu0 }
 0x84b   : > { %v1326_v44 = vpop.f32.mrb[22].mxu0 }
 0x84c   : > { %3384 = vpow2.f32 %v2675_v35  ;;  %v2968_v46 = vpop.f32.mrb[23].mxu0 }
 0x856   : > { %v3385_v50 = vpop.eup %3384 }
 0x857   : > { %v1332_v22 = vadd.f32 1.0, %v3385_v50 }
 0x859   : > { %3386 = vrcp.f32 %v1332_v22 }
 0x863   : > { %v3387_v24 = vpop.eup %3386 }
 0x864   : > { %v1335_v43 = vmul.f32 2.0, %v3387_v24 }
 0x866   : > { %v1336_v25 = vmul.f32 %v1335_v43, %v1235_v23 }
 0x868   : > { %v1337_v26 = vpack.c.bf16 %v1336_v25, %v1336_v25 }
 0x86a   : > { %2972 = vmatmul.mubr.msk.bf16.vlgmr.msra.gmra.mrb[16].mxu1 %vm670_vm1, %v1337_v26  ;;  %2978 = vmatmul.mubr.msk.bf16.vlgmr.msra.gmra.mrb[24].mxu0 %vm670_vm1, %v1337_v26 }
 0x86b   : > { %1390 = vmatpush1.bf16.msra.mxu1 %v4094_v37  ;;  %1421 = vmatprep.mubr.bf16.mxu1 %v3703_v38 }
 0x86c   : > { %1471 = vmatprep.subr.bf16.mxu1 %v4113_v51  ;;  %2982 = vmatpush3.bf16.msra.mxu0 %v4119_v53 }
 0x86d   : > { %2983 = vmatprep.subr.bf16.mxu0 %v3701_v2  ;;  %2997 = vmatprep.mubr.msk.bf16.mxu0 %vm3702_vm0, %v3701_v2 }
 0x870   : > { %2984 = vmatpush3.bf16.msra.mxu0 %v4132_v56 }
 0x871   : > { %2985 = vmatprep.subr.bf16.mxu0 %v3701_v2 }
 0x872   : > { %2678 = vmatmul.mubr.msk.bf16.vlgmr.msra.gmra.mrb[20].mxu1 %vm670_vm1, %v1337_v26 }
 0x873   : > { %1472 = vmatpush1.bf16.msra.mxu1 %v4116_v52  ;;  %1503 = vmatprep.mubr.bf16.mxu1 %v3703_v38 }
 0x874   : > { %1473 = vmatprep.subr.bf16.mxu1 %v4125_v54  ;;  %2986 = vmatpush3.bf16.msra.mxu0 %v4145_v59 }
 0x875   : > { %2987 = vmatprep.subr.bf16.mxu0 %v3701_v2 }
 0x877   : > { %1474 = vmatpush1.bf16.msra.mxu1 %v4129_v55 }
 0x878   : > { %1475 = vmatprep.subr.bf16.mxu1 %v4138_v57  ;;  %2988 = vmatpush3.bf16.msra.mxu0 %v4158_v62 }
 0x879   : > { %2989 = vmatprep.subr.bf16.mxu0 %v3701_v2 }
 0x87b   : > { %1476 = vmatpush1.bf16.msra.mxu1 %v4142_v58 }
 0x87c   : > { %1477 = vmatprep.subr.bf16.mxu1 %v4151_v60  ;;  %2990 = vmatpush3.bf16.msra.mxu0 %v4171_v11 }
 0x87d   : > { %2991 = vmatprep.subr.bf16.mxu0 %v3701_v2 }
 0x87f   : > { %1478 = vmatpush1.bf16.msra.mxu1 %v4155_v61 }
 0x880   : > { %1479 = vmatprep.subr.bf16.mxu1 %v4164_v63  ;;  %2992 = vmatpush3.bf16.msra.mxu0 %v4184_v15 }
 0x881   : > { %2993 = vmatprep.subr.bf16.mxu0 %v3701_v2 }
 0x883   : > { %1480 = vmatpush1.bf16.msra.mxu1 %v4168_v0 }
 0x884   : > { %1481 = vmatprep.subr.bf16.mxu1 %v4177_v13  ;;  %2994 = vmatpush3.bf16.msra.mxu0 %v4197_v18 }
 0x885   : > { %2995 = vmatprep.subr.bf16.mxu0 %v3701_v2 }
 0x887   : > { %1482 = vmatpush1.bf16.msra.mxu1 %v4181_v14 }
 0x888   : > { %1483 = vmatprep.subr.bf16.mxu1 %v4190_v16  ;;  %2996 = vmatpush3.bf16.msra.mxu0 %v4210_v21 }
 0x889   : > { %3021 = vmatprep.subr.bf16.mxu0 %v3701_v2 }
 0x88b   : > { %1484 = vmatpush1.bf16.msra.mxu1 %v4194_v17 }
 0x88c   : > { %1485 = vmatprep.subr.bf16.mxu1 %v4203_v19 }
 0x88f   : > { %1486 = vmatpush1.bf16.msra.mxu1 %v4207_v20 }
 0x890   : > { %3001 = vmatprep.subr.bf16.mxu1 %v3701_v2 }
 0x93d   : > { %v1375_v23 = vpop.f32.mrb[16].mxu1  ;;  %v1464_v28 = vpop.f32.mrb[24].mxu0 }
 0x93e   : > { %v2677_v47 = vmul.f32 -1.442695, %v1375_v23  ;;  %v2973_v29 = vpop.f32.mrb[17].mxu1  ;;  %v2979_v30 = vpop.f32.mrb[25].mxu0 }
 0x93f   : > { %v1378_v31 = vpop.f32.mrb[18].mxu1  ;;  %v1467_v39 = vpop.f32.mrb[26].mxu0 }
 0x940   : > { %3388 = vpow2.f32 %v2677_v47  ;;  %v2974_v10 = vpop.f32.mrb[19].mxu1  ;;  %v2980_v33 = vpop.f32.mrb[27].mxu0 }
 0x94a   : > { %v3389_v35 = vpop.eup %3388 }
 0x94b   : > { %v1384_v40 = vadd.f32 1.0, %v3389_v35 }
 0x94d   : > { %3390 = vrcp.f32 %v1384_v40 }
 0x957   : > { %v3391_v44 = vpop.eup %3390 }
 0x958   : > { %v1387_v46 = vmul.f32 2.0, %v3391_v44 }
 0x95a   : > { %v1388_v50 = vmul.f32 %v1387_v46, %v4314_v32  ;;  %v1465_v46 = vadd.f32 %v1464_v28, %v4261_v42 }
 0x95c   : > { %v1470_v22 = vpack.c.bf16 %v1388_v50, %v1388_v50 }
 0x95e   : > { %1504 = vmatmul.mubr.bf16.vlgmr.msra.gmra.mrb[20].mxu1 %v1470_v22  ;;  %2998 = vmatmul.mubr.bf16.vlgmr.msra.gmra.mrb[28].mxu0 %v1470_v22 }
 0x95f   : > { %3002 = vmatpush3.bf16.msra.mxu1 %v4005_v1  ;;  %3017 = vmatprep.mubr.msk.bf16.mxu1 %vm3702_vm0, %v3701_v2 }
 0x960   : > { %3003 = vmatprep.subr.bf16.mxu1 %v3701_v2  ;;  %3022 = vmatpush3.bf16.msra.mxu0 %v4057_v12 }
 0x961   : > { %3023 = vmatprep.mubr.msk.bf16.mxu0 %vm3702_vm0, %v3701_v2  ;;  %3027 = vmatprep.subr.bf16.mxu0 %v3701_v2 }
 0x963   : > { %3004 = vmatpush3.bf16.msra.mxu1 %v4011_v3 }
 0x964   : > { %3005 = vmatprep.subr.bf16.mxu1 %v3701_v2 }
 0x967   : > { %3006 = vmatpush3.bf16.msra.mxu1 %v4020_v4 }
 0x968   : > { %3007 = vmatprep.subr.bf16.mxu1 %v3701_v2 }
 0x96b   : > { %3008 = vmatpush3.bf16.msra.mxu1 %v4024_v5 }
 0x96c   : > { %3009 = vmatprep.subr.bf16.mxu1 %v3701_v2 }
 0x96f   : > { %3010 = vmatpush3.bf16.msra.mxu1 %v4029_v6 }
 0x970   : > { %3011 = vmatprep.subr.bf16.mxu1 %v3701_v2 }
 0x973   : > { %3012 = vmatpush3.bf16.msra.mxu1 %v4034_v7 }
 0x974   : > { %3013 = vmatprep.subr.bf16.mxu1 %v3701_v2 }
 0x977   : > { %3014 = vmatpush3.bf16.msra.mxu1 %v4040_v8 }
 0x978   : > { %3015 = vmatprep.subr.bf16.mxu1 %v3701_v2 }
 0x97b   : > { %3016 = vmatpush3.bf16.msra.mxu1 %v4045_v9 }
 0x97c   : > { %3047 = vmatprep.subr.bf16.mxu1 %v3701_v2 }
 0xa31   : > { %v1505_v1 = vpop.f32.mrb[20].mxu1  ;;  %v1546_v3 = vpop.f32.mrb[28].mxu0 }
 0xa32   : > { %v3159_v32 = vadd.f32 %v1505_v1, %v4251_v45  ;;  %v1507_v24 = vpop.f32.mrb[21].mxu1  ;;  %v2999_v43 = vpop.f32.mrb[29].mxu0  ;;  %v1566_v40 = vadd.f32 %v4259_v34, %v1546_v3 }
 0xa33   : > { %v1509_v25 = vpop.f32.mrb[22].mxu1  ;;  %v1549_v26 = vpop.f32.mrb[30].mxu0  ;;  %v3160_v30 = vadd.f32 %v1507_v24, %v4253_v48  ;;  %v1574_v43 = vstv %s1183_s28  ;;  %s3567_s28 = sshll.u32 %s3704_s2, 4  ;;  %s3568_s28 = int_to_ptr.vmem [resolvable:$false] %s3567_s28 }
 0xa34   : > { %v2680_v23 = vmul.f32 -1.442695, %v3159_v32  ;;  %v1510_v47 = vpop.f32.mrb[23].mxu1  ;;  %v3000_v29 = vpop.f32.mrb[31].mxu0  ;;  %vm1575_vm3 = vcmp.lt.s32.totalorder %v4246_v41, %v1574_v43  ;;  %p3570_p4 = scmp.lt.s32.totalorder %s4655_s0, %s3568_s28 }
 0xa35   : > { %v2681_v31 = vmul.f32 -1.442695, %v3160_v30 }
 0xa36   : > { %3392 = vpow2.f32 %v2680_v23 }
 0xa37   : > { %3394 = vpow2.f32 %v2681_v31 }
 0xa40   : > { %v3393_v39 = vpop.eup %3392 }
 0xa41   : > { %v1556_v10 = vadd.f32 1.0, %v3393_v39  ;;  %v3395_v33 = vpop.eup %3394 }
 0xa42   : > { %v1563_v35 = vadd.f32 1.0, %v3395_v33 }
 0xa43   : > { %3396 = vrcp.f32 %v1556_v10 }
 0xa44   : > { %3398 = vrcp.f32 %v1563_v35 }
 0xa4d   : > { %v3397_v44 = vpop.eup %3396 }
 0xa4e   : > { %v1567_v22 = vmul.f32 %v3397_v44, %v1566_v40  ;;  %v3399_v32 = vpop.eup %3398  ;;  %v4416_v44 = vld [vmem:[%s3979_s3] sm:$0xff]  }
 0xa4f   : > { %v1570_v24 = vsub.f32 1.0, %v3399_v32  ;;  %v1572_v23 = vmul.f32 %v3399_v32, %v1388_v50 }
 0xa50   : > { %v1568_v1 = vadd.f32 %v1567_v22, %v1465_v46  ;;  %v4423_v46 = vld [vmem:[%s3979_s3 + $0x8] sm:$0xff]  }
 0xa52   : > { %3400 = vtanh.f32 %v1568_v1 }
 0xa5c   : > { %v3401_v25 = vpop.eup %3400 }
 0xa5d   : > { %v1571_v26 = vmul.f32 %v3401_v25, %v1570_v24 }
 0xa5f   : > { %v1573_v3 = vadd.f32 %v1572_v23, %v1571_v26 }
 0xa61   : > { %v4397_v28 = vsel %vm1575_vm3, %v1573_v3, %v4277_v27 }
 0xa62   : > { %1578 = vst [vmem:[%s1577_s1] sm:$0xff] %v4397_v28  ;;  %v1586_v47 = vpack.c.bf16 %v4397_v28, %v4397_v28  ;;  %s3569_s1 = scalar_lea.vmem %s3568_s28, 1024 }
 0xa63   : > { %p3571_p1 = scmp.lt.s32.totalorder %s3569_s1, %s3563_s30 }
 0xa64   : > { %3018 = vmatmul.mubr.bf16.vlgmr.msra.gmra.mrb[24].mxu1 %v1586_v47 }
 0xa65   : > { %3048 = vmatpush3.bf16.msra.mxu1 %v4057_v12  ;;  %3049 = vmatprep.mubr.msk.bf16.mxu1 %vm3702_vm0, %v3701_v2  ;;  %p3572_p6 = por %p3571_p1, %p3570_p4 }
 0xa66   : > { %1788 = vmatprep.subr.bf16.mxu1 %v4091_v36  ;;  %v1585_v36 = vld [vmem:[%s1584_s27] sm:$0xff] }
 0xa67   : > { %p3573_p11 = pnand %p3572_p6, %p3566_p10 }
 0xb37   : > { %v1621_v50 = vpop.f32.mrb[24].mxu1 }
 0xb38   : > { %v2684_v29 = vmul.f32 -1.442695, %v1621_v50  ;;  %v3019_v30 = vpop.f32.mrb[25].mxu1 }
 0xb39   : > { %v1624_v27 = vpop.f32.mrb[26].mxu1 }
 0xb3a   : > { %3402 = vpow2.f32 %v2684_v29  ;;  %v3020_v31 = vpop.f32.mrb[27].mxu1 }
 0xb44   : > { %v3403_v39 = vpop.eup %3402 }
 0xb45   : > { %v1630_v10 = vadd.f32 1.0, %v3403_v39 }
 0xb47   : > { %3404 = vrcp.f32 %v1630_v10 }
 0xb51   : > { %v3405_v12 = vpop.eup %3404 }
 0xb52   : > { %v1633_v33 = vmul.f32 2.0, %v3405_v12 }
 0xb54   : > { %v1634_v35 = vmul.f32 %v1633_v33, %v1585_v36 }
 0xb56   : > { %v1635_v40 = vpack.c.bf16 %v1634_v35, %v1634_v35 }
 0xb58   : > { %3024 = vmatmul.mubr.msk.bf16.vlgmr.msra.gmra.mrb[32].mxu0 %vm670_vm1, %v1635_v40 }
 0xb59   : > { %3028 = vmatpush3.bf16.msra.mxu0 %v4416_v44  ;;  %3043 = vmatprep.mubr.msk.bf16.mxu0 %vm3702_vm0, %v3701_v2 }
 0xb5a   : > { %3029 = vmatprep.subr.bf16.mxu0 %v3701_v2 }
 0xb5d   : > { %3030 = vmatpush3.bf16.msra.mxu0 %v4423_v46 }
 0xb5e   : > { %3031 = vmatprep.subr.bf16.mxu0 %v3701_v2 }
 0xb61   : > { %3032 = vmatpush3.bf16.msra.mxu0 %v4020_v4 }
 0xb62   : > { %3033 = vmatprep.subr.bf16.mxu0 %v3701_v2 }
 0xb65   : > { %3034 = vmatpush3.bf16.msra.mxu0 %v4024_v5 }
 0xb66   : > { %3035 = vmatprep.subr.bf16.mxu0 %v3701_v2 }
 0xb69   : > { %3036 = vmatpush3.bf16.msra.mxu0 %v4029_v6 }
 0xb6a   : > { %3037 = vmatprep.subr.bf16.mxu0 %v3701_v2 }
 0xb6d   : > { %3038 = vmatpush3.bf16.msra.mxu0 %v4034_v7 }
 0xb6e   : > { %3039 = vmatprep.subr.bf16.mxu0 %v3701_v2 }
 0xb71   : > { %3040 = vmatpush3.bf16.msra.mxu0 %v4040_v8 }
 0xb72   : > { %3041 = vmatprep.subr.bf16.mxu0 %v3701_v2 }
 0xb75   : > { %3042 = vmatpush3.bf16.msra.mxu0 %v4045_v9 }
 0xb76   : > { %3053 = vmatprep.subr.bf16.mxu0 %v3701_v2 }
 0xc2b   : > { %v1673_v4 = vpop.f32.mrb[32].mxu0 }
 0xc2c   : > { %v2686_v5 = vmul.f32 -1.442695, %v1673_v4  ;;  %v3025_v22 = vpop.f32.mrb[33].mxu0 }
 0xc2d   : > { %v1676_v1 = vpop.f32.mrb[34].mxu0 }
 0xc2e   : > { %3406 = vpow2.f32 %v2686_v5  ;;  %v3026_v6 = vpop.f32.mrb[35].mxu0 }
 0xc38   : > { %v3407_v32 = vpop.eup %3406 }
 0xc39   : > { %v1682_v24 = vadd.f32 1.0, %v3407_v32 }
 0xc3b   : > { %3408 = vrcp.f32 %v1682_v24 }
 0xc45   : > { %v3409_v7 = vpop.eup %3408 }
 0xc46   : > { %v1685_v43 = vmul.f32 2.0, %v3409_v7 }
 0xc48   : > { %v4440_v25 = vmul.f32 %v1685_v43, %v4397_v28 }
 0xc4a   : > { %v1687_v8 = vpack.c.bf16 %v4440_v25, %v4440_v25 }
 0xc4c   : > { %3044 = vmatmul.mubr.bf16.vlgmr.msra.gmra.mrb[36].mxu0 %v1687_v8 }
 0xc4d   : > { %3054 = vmatpush3.bf16.msra.mxu0 %v4100_v49  ;;  %3055 = vmatprep.mubr.msk.bf16.mxu0 %vm3702_vm0, %v3701_v2 }
 0xc4e   : > { %3059 = vmatprep.subr.bf16.mxu0 %v3701_v2 }
 0xd1f   : > { %v1722_v9 = vpop.f32.mrb[36].mxu0 }
 0xd20   : > { %v2687_v26 = vmul.f32 -1.442695, %v1722_v9  ;;  %v3045_v23 = vpop.f32.mrb[37].mxu0 }
 0xd21   : > { %v1725_v3 = vpop.f32.mrb[38].mxu0 }
 0xd22   : > { %3410 = vpow2.f32 %v2687_v26  ;;  %v3046_v47 = vpop.f32.mrb[39].mxu0 }
 0xd2c   : > { %v3411_v50 = vpop.eup %3410 }
 0xd2d   : > { %v1731_v29 = vadd.f32 1.0, %v3411_v50 }
 0xd2f   : > { %3412 = vrcp.f32 %v1731_v29 }
 0xd39   : > { %v3413_v30 = vpop.eup %3412 }
 0xd3a   : > { %v1734_v27 = vmul.f32 2.0, %v3413_v30 }
 0xd3c   : > { %v1735_v31 = vmul.f32 %v1734_v27, %v1634_v35  ;;  %v3463_v27 = vld [vmem:[%s3989_s13 + $0x4] ss:$12 sps:$4 sm:$0xff]  }
 0xd3e   : > { %v1736_v39 = vpack.c.bf16 %v1735_v31, %v1735_v31 }
 0xd40   : > { %3050 = vmatmul.mubr.msk.bf16.vlgmr.msra.gmra.mrb[28].mxu1 %vm670_vm1, %v1736_v39  ;;  %3056 = vmatmul.mubr.msk.bf16.vlgmr.msra.gmra.mrb[40].mxu0 %vm670_vm1, %v1736_v39 }
 0xd41   : > { %1789 = vmatpush1.bf16.msra.mxu1 %v4094_v37  ;;  %1820 = vmatprep.mubr.bf16.mxu1 %v3703_v38 }
 0xd42   : > { %1870 = vmatprep.subr.bf16.mxu1 %v4113_v51  ;;  %3060 = vmatpush3.bf16.msra.mxu0 %v4119_v53 }
 0xd43   : > { %3061 = vmatprep.subr.bf16.mxu0 %v3701_v2  ;;  %3075 = vmatprep.mubr.msk.bf16.mxu0 %vm3702_vm0, %v3701_v2 }
 0xd46   : > { %3062 = vmatpush3.bf16.msra.mxu0 %v4132_v56 }
 0xd47   : > { %3063 = vmatprep.subr.bf16.mxu0 %v3701_v2 }
 0xd48   : > { %2690 = vmatmul.mubr.msk.bf16.vlgmr.msra.gmra.mrb[32].mxu1 %vm670_vm1, %v1736_v39 }
 0xd49   : > { %1871 = vmatpush1.bf16.msra.mxu1 %v4116_v52  ;;  %1902 = vmatprep.mubr.bf16.mxu1 %v3703_v38 }
 0xd4a   : > { %1872 = vmatprep.subr.bf16.mxu1 %v4125_v54  ;;  %3064 = vmatpush3.bf16.msra.mxu0 %v4145_v59 }
 0xd4b   : > { %3065 = vmatprep.subr.bf16.mxu0 %v3701_v2 }
 0xd4d   : > { %1873 = vmatpush1.bf16.msra.mxu1 %v4129_v55 }
 0xd4e   : > { %1874 = vmatprep.subr.bf16.mxu1 %v4138_v57  ;;  %3066 = vmatpush3.bf16.msra.mxu0 %v4158_v62 }
 0xd4f   : > { %3067 = vmatprep.subr.bf16.mxu0 %v3701_v2 }
 0xd51   : > { %1875 = vmatpush1.bf16.msra.mxu1 %v4142_v58 }
 0xd52   : > { %1876 = vmatprep.subr.bf16.mxu1 %v4151_v60  ;;  %3068 = vmatpush3.bf16.msra.mxu0 %v4171_v11  ;;  %v4510_v11 = vld [vmem:[%s3979_s3 + $0x10] sm:$0xff]  }
 0xd53   : > { %3069 = vmatprep.subr.bf16.mxu0 %v3701_v2 }
 0xd55   : > { %1877 = vmatpush1.bf16.msra.mxu1 %v4155_v61 }
 0xd56   : > { %1878 = vmatprep.subr.bf16.mxu1 %v4164_v63  ;;  %3070 = vmatpush3.bf16.msra.mxu0 %v4184_v15  ;;  %v4525_v15 = vld [vmem:[%s3979_s3 + $0x28] sm:$0xff]  }
 0xd57   : > { %3071 = vmatprep.subr.bf16.mxu0 %v3701_v2 }
 0xd59   : > { %1879 = vmatpush1.bf16.msra.mxu1 %v4168_v0  ;;  %v4501_v0 = vld [vmem:[%s3950_s23] sm:$0xff]   ;;  %s1581_s23 = sadd.s32 %s3971_s12, %s4408_s22 }
 0xd5a   : > { %1880 = vmatprep.subr.bf16.mxu1 %v4177_v13  ;;  %3072 = vmatpush3.bf16.msra.mxu0 %v4197_v18  ;;  %v4515_v13 = vld [vmem:[%s3979_s3 + $0x18] sm:$0xff]  }
 0xd5b   : > { %3073 = vmatprep.subr.bf16.mxu0 %v3701_v2 }
 0xd5d   : > { %1881 = vmatpush1.bf16.msra.mxu1 %v4181_v14  ;;  %v4520_v14 = vld [vmem:[%s3979_s3 + $0x20] sm:$0xff]  }
 0xd5e   : > { %1882 = vmatprep.subr.bf16.mxu1 %v4190_v16  ;;  %3074 = vmatpush3.bf16.msra.mxu0 %v4210_v21  ;;  %v4530_v16 = vld [vmem:[%s3979_s3 + $0x30] sm:$0xff]  }
 0xd5f   : > { %3099 = vmatprep.subr.bf16.mxu0 %v3701_v2 }
 0xd61   : > { %1883 = vmatpush1.bf16.msra.mxu1 %v4194_v17  ;;  %v4535_v17 = vld [vmem:[%s3979_s3 + $0x38] sm:$0xff]   ;;  %s1582_s3 = sld [smem:[#allocation4 + %s1581_s23]] }
 0xd62   : > { %1884 = vmatprep.subr.bf16.mxu1 %v4203_v19 }
 0xd65   : > { %1885 = vmatpush1.bf16.msra.mxu1 %v4207_v20 }
 0xd66   : > { %3079 = vmatprep.subr.bf16.mxu1 %v3701_v2 }
 0xd67   : > { %v1973_v23 = vstv %s1582_s3 }
 0xd68   : > { %vm1974_vm4 = vcmp.lt.s32.totalorder %v4246_v41, %v1973_v23  ;;  %v3481_v23 = vld [vmem:[%s3956_s8 + $0x60] ss:$12 sps:$4 sm:$0xff]  }
 0xe13   : > { %v1774_v37 = vpop.f32.mrb[28].mxu1  ;;  %v4489_v49 = vpop.f32.mrb[40].mxu0 }
 0xe14   : > { %v2689_v51 = vmul.f32 -1.442695, %v1774_v37  ;;  %v3051_v52 = vpop.f32.mrb[29].mxu1  ;;  %v3057_v53 = vpop.f32.mrb[41].mxu0  ;;  %v1864_v43 = vadd.f32 %v4489_v49, %v4261_v42 }
 0xe15   : > { %v1777_v54 = vpop.f32.mrb[30].mxu1  ;;  %v1866_v55 = vpop.f32.mrb[42].mxu0 }
 0xe16   : > { %3414 = vpow2.f32 %v2689_v51  ;;  %v3052_v56 = vpop.f32.mrb[31].mxu1  ;;  %v3058_v57 = vpop.f32.mrb[43].mxu0  ;;  %v1984_v54 = vld [vmem:[%s1983_s6] sm:$0xff] }
 0xe20   : > { %v3415_v58 = vpop.eup %3414 }
 0xe21   : > { %v1783_v59 = vadd.f32 1.0, %v3415_v58 }
 0xe23   : > { %3416 = vrcp.f32 %v1783_v59 }
 0xe2d   : > { %v3417_v60 = vpop.eup %3416 }
 0xe2e   : > { %v1786_v61 = vmul.f32 2.0, %v3417_v60 }
 0xe30   : > { %v4492_v62 = vmul.f32 %v1786_v61, %v4440_v25 }
 0xe32   : > { %v1869_v63 = vpack.c.bf16 %v4492_v62, %v4492_v62 }
 0xe34   : > { %1903 = vmatmul.mubr.bf16.vlgmr.msra.gmra.mrb[32].mxu1 %v1869_v63  ;;  %3076 = vmatmul.mubr.bf16.vlgmr.msra.gmra.mrb[44].mxu0 %v1869_v63 }
 0xe35   : > { %3080 = vmatpush3.bf16.msra.mxu1 %v4416_v44  ;;  %3095 = vmatprep.mubr.msk.bf16.mxu1 %vm3702_vm0, %v3701_v2 }
 0xe36   : > { %3081 = vmatprep.subr.bf16.mxu1 %v3701_v2  ;;  %3100 = vmatpush3.bf16.msra.mxu0 %v4501_v0 }
 0xe37   : > { %3101 = vmatprep.mubr.msk.bf16.mxu0 %vm3702_vm0, %v3701_v2  ;;  %3105 = vmatprep.subr.bf16.mxu0 %v3701_v2 }
 0xe39   : > { %3082 = vmatpush3.bf16.msra.mxu1 %v4423_v46 }
 0xe3a   : > { %3083 = vmatprep.subr.bf16.mxu1 %v3701_v2 }
 0xe3d   : > { %3084 = vmatpush3.bf16.msra.mxu1 %v4510_v11 }
 0xe3e   : > { %3085 = vmatprep.subr.bf16.mxu1 %v3701_v2 }
 0xe41   : > { %3086 = vmatpush3.bf16.msra.mxu1 %v4515_v13 }
 0xe42   : > { %3087 = vmatprep.subr.bf16.mxu1 %v3701_v2 }
 0xe45   : > { %3088 = vmatpush3.bf16.msra.mxu1 %v4520_v14 }
 0xe46   : > { %3089 = vmatprep.subr.bf16.mxu1 %v3701_v2 }
 0xe49   : > { %3090 = vmatpush3.bf16.msra.mxu1 %v4525_v15 }
 0xe4a   : > { %3091 = vmatprep.subr.bf16.mxu1 %v3701_v2 }
 0xe4d   : > { %3092 = vmatpush3.bf16.msra.mxu1 %v4530_v16 }
 0xe4e   : > { %3093 = vmatprep.subr.bf16.mxu1 %v3701_v2 }
 0xe51   : > { %3094 = vmatpush3.bf16.msra.mxu1 %v4535_v17 }
 0xe52   : > { %3125 = vmatprep.subr.bf16.mxu1 %v3701_v2 }
 0xf07   : > { %v1904_v18 = vpop.f32.mrb[32].mxu1  ;;  %v1945_v19 = vpop.f32.mrb[44].mxu0 }
 0xf08   : > { %v3161_v20 = vadd.f32 %v1904_v18, %v4251_v45  ;;  %v1906_v21 = vpop.f32.mrb[33].mxu1  ;;  %v3077_v10 = vpop.f32.mrb[45].mxu0  ;;  %v1965_v24 = vadd.f32 %v4259_v34, %v1945_v19 }
 0xf09   : > { %v1908_v12 = vpop.f32.mrb[34].mxu1  ;;  %v1948_v36 = vpop.f32.mrb[46].mxu0  ;;  %v3162_v4 = vadd.f32 %v1906_v21, %v4253_v48 }
 0xf0a   : > { %v2692_v33 = vmul.f32 -1.442695, %v3161_v20  ;;  %v1909_v35 = vpop.f32.mrb[35].mxu1  ;;  %v3078_v40 = vpop.f32.mrb[47].mxu0 }
 0xf0b   : > { %v2693_v5 = vmul.f32 -1.442695, %v3162_v4  ;;  %v3465_v35 = vld [vmem:[%s3989_s13] ss:$12 sps:$4 sm:$0xff]   ;;  %v3466_v40 = vld [vmem:[%s3956_s8 + $0x4] ss:$12 sps:$4 sm:$0xff]  }
 0xf0c   : > { %3418 = vpow2.f32 %v2692_v33  ;;  %v3467_v4 = vld [vmem:[%s3956_s8 + $0x8] ss:$12 sps:$4 sm:$0xff]  }
 0xf0d   : > { %3420 = vpow2.f32 %v2693_v5  ;;  %v3468_v5 = vld [vmem:[%s3956_s8 + $0x20] ss:$12 sps:$4 sm:$0xff]  }
 0xf16   : > { %v3419_v22 = vpop.eup %3418 }
 0xf17   : > { %v1955_v1 = vadd.f32 1.0, %v3419_v22  ;;  %v3421_v6 = vpop.eup %3420  ;;  %v3469_v22 = vld [vmem:[%s3956_s8] ss:$12 sps:$4 sm:$0xff]  }
 0xf18   : > { %v1962_v32 = vadd.f32 1.0, %v3421_v6  ;;  %v3471_v6 = vld [vmem:[%s3956_s8 + $0x38] ss:$12 sps:$4 sm:$0xff]  }
 0xf19   : > { %3422 = vrcp.f32 %v1955_v1  ;;  %v3470_v1 = vld [vmem:[%s3956_s8 + $0x1c] ss:$12 sps:$4 sm:$0xff]  }
 0xf1a   : > { %3424 = vrcp.f32 %v1962_v32  ;;  %v3472_v32 = vld [vmem:[%s3956_s8 + $0x18] ss:$12 sps:$4 sm:$0xff]  }
 0xf23   : > { %v3423_v7 = vpop.eup %3422 }
 0xf24   : > { %v1966_v25 = vmul.f32 %v3423_v7, %v1965_v24  ;;  %v3425_v9 = vpop.eup %3424  ;;  %v3473_v24 = vld [vmem:[%s3956_s8 + $0x34] ss:$12 sps:$4 sm:$0xff]   ;;  %v3474_v7 = vld [vmem:[%s3956_s8 + $0x50] ss:$12 sps:$4 sm:$0xff]  }
 0xf25   : > { %v1969_v26 = vsub.f32 1.0, %v3425_v9  ;;  %v1971_v34 = vmul.f32 %v3425_v9, %v4492_v62  ;;  %v3479_v9 = vld [vmem:[%s3956_s8 + $0x64] ss:$12 sps:$4 sm:$0xff]  }
 0xf26   : > { %v1967_v8 = vadd.f32 %v1966_v25, %v1864_v43  ;;  %v3476_v43 = vld [vmem:[%s3956_s8 + $0x4c] ss:$12 sps:$4 sm:$0xff]   ;;  %v3477_v25 = vld [vmem:[%s3956_s8 + $0x68] ss:$12 sps:$4 sm:$0xff]  }
 0xf28   : > { %3426 = vtanh.f32 %v1967_v8  ;;  %v3478_v8 = vld [vmem:[%s3956_s8 + $0x48] ss:$12 sps:$4 sm:$0xff]  }
 0xf32   : > { %v3427_v3 = vpop.eup %3426 }
 0xf33   : > { %v1970_v47 = vmul.f32 %v3427_v3, %v1969_v26  ;;  %v3480_v26 = vld [vmem:[%s3956_s8 + $0x80] ss:$12 sps:$4 sm:$0xff]   ;;  %v3482_v3 = vld [vmem:[%s3956_s8 + $0x7c] ss:$12 sps:$4 sm:$0xff]  }
 0xf35   : > { %v1972_v50 = vadd.f32 %v1971_v34, %v1970_v47  ;;  %v3483_v47 = vld [vmem:[%s3956_s8 + $0x98] ss:$12 sps:$4 sm:$0xff]  }
 0xf36   : > { %v3484_v34 = vld [vmem:[%s3956_s8 + $0x78] ss:$12 sps:$4 sm:$0xff]  }
 0xf37   : > { %v4552_v29 = vsel %vm1974_vm4, %v1972_v50, %v4397_v28  ;;  %v3485_v50 = vld [vmem:[%s3956_s8 + $0x94] ss:$12 sps:$4 sm:$0xff]  }
 0xf38   : > { %1977 = vst [vmem:[%s1976_s21] sm:$0xff] %v4552_v29  ;;  %v1985_v30 = vpack.c.bf16 %v4552_v29, %v4552_v29 }
 0xf3a   : > { %3096 = vmatmul.mubr.bf16.vlgmr.msra.gmra.mrb[36].mxu1 %v1985_v30  ;;  %v3486_v30 = vld [vmem:[%s3956_s8 + $0xb0] ss:$12 sps:$4 sm:$0xff]  }
 0xf3b   : > { %3126 = vmatpush3.bf16.msra.mxu1 %v4501_v0  ;;  %3127 = vmatprep.mubr.msk.bf16.mxu1 %vm3702_vm0, %v3701_v2 }
 0xf3c   : > { %2187 = vmatprep.subr.bf16.mxu1 %v3463_v27  ;;  %v3487_v27 = vld [vmem:[%s3956_s8 + $0x90] ss:$12 sps:$4 sm:$0xff]  }
0x100d   : > { %v2020_v31 = vpop.f32.mrb[36].mxu1 }
0x100e   : > { %v2695_v39 = vmul.f32 -1.442695, %v2020_v31  ;;  %v3097_v37 = vpop.f32.mrb[37].mxu1  ;;  %v3488_v31 = vld [vmem:[%s3956_s8 + $0xac] ss:$12 sps:$4 sm:$0xff]  }
0x100f   : > { %v2023_v28 = vpop.f32.mrb[38].mxu1 }
0x1010   : > { %3428 = vpow2.f32 %v2695_v39  ;;  %v3098_v49 = vpop.f32.mrb[39].mxu1  ;;  %v3489_v39 = vld [vmem:[%s3956_s8 + $0xa8] ss:$12 sps:$4 sm:$0xff]  }
0x101a   : > { %v3429_v51 = vpop.eup %3428 }
0x101b   : > { %v2029_v52 = vadd.f32 1.0, %v3429_v51 }
0x101d   : > { %3430 = vrcp.f32 %v2029_v52 }
0x1027   : > { %v3431_v53 = vpop.eup %3430 }
0x1028   : > { %v2032_v55 = vmul.f32 2.0, %v3431_v53 }
0x102a   : > { %v2033_v56 = vmul.f32 %v2032_v55, %v1984_v54 }
0x102c   : > { %v2034_v57 = vpack.c.bf16 %v2033_v56, %v2033_v56 }
0x102e   : > { %3102 = vmatmul.mubr.msk.bf16.vlgmr.msra.gmra.mrb[48].mxu0 %vm670_vm1, %v2034_v57 }
0x102f   : > { %3106 = vmatpush3.bf16.msra.mxu0 %v4416_v44  ;;  %3121 = vmatprep.mubr.msk.bf16.mxu0 %vm3702_vm0, %v3701_v2 }
0x1030   : > { %3107 = vmatprep.subr.bf16.mxu0 %v3701_v2 }
0x1033   : > { %3108 = vmatpush3.bf16.msra.mxu0 %v4423_v46 }
0x1034   : > { %3109 = vmatprep.subr.bf16.mxu0 %v3701_v2 }
0x1037   : > { %3110 = vmatpush3.bf16.msra.mxu0 %v4510_v11 }
0x1038   : > { %3111 = vmatprep.subr.bf16.mxu0 %v3701_v2 }
0x103b   : > { %3112 = vmatpush3.bf16.msra.mxu0 %v4515_v13 }
0x103c   : > { %3113 = vmatprep.subr.bf16.mxu0 %v3701_v2 }
0x103f   : > { %3114 = vmatpush3.bf16.msra.mxu0 %v4520_v14  ;;  %v3464_v14 = vld [vmem:[%s3989_s13 + $0x8] ss:$12 sps:$4 sm:$0xff]   ;;  %s1980_s13 = sadd.s32 %s3971_s12, %s4563_s29 }
0x1040   : > { %3115 = vmatprep.subr.bf16.mxu0 %v3701_v2  ;;  %s1981_s14 = sld [smem:[#allocation4 + %s1980_s13]] }
0x1043   : > { %3116 = vmatpush3.bf16.msra.mxu0 %v4525_v15 }
0x1044   : > { %3117 = vmatprep.subr.bf16.mxu0 %v3701_v2 }
0x1047   : > { %3118 = vmatpush3.bf16.msra.mxu0 %v4530_v16 }
0x1048   : > { %3119 = vmatprep.subr.bf16.mxu0 %v3701_v2 }
0x104b   : > { %3120 = vmatpush3.bf16.msra.mxu0 %v4535_v17 }
0x104c   : > { %3131 = vmatprep.subr.bf16.mxu0 %v3701_v2 }
0x1101   : > { %v2072_v44 = vpop.f32.mrb[48].mxu0 }
0x1102   : > { %v2697_v46 = vmul.f32 -1.442695, %v2072_v44  ;;  %v3103_v58 = vpop.f32.mrb[49].mxu0 }
0x1103   : > { %v2075_v59 = vpop.f32.mrb[50].mxu0 }
0x1104   : > { %3432 = vpow2.f32 %v2697_v46  ;;  %v3104_v60 = vpop.f32.mrb[51].mxu0 }
0x110e   : > { %v3433_v61 = vpop.eup %3432 }
0x110f   : > { %v2081_v62 = vadd.f32 1.0, %v3433_v61 }
0x1111   : > { %3434 = vrcp.f32 %v2081_v62 }
0x111b   : > { %v3435_v63 = vpop.eup %3434 }
0x111c   : > { %v2084_v0 = vmul.f32 2.0, %v3435_v63 }
0x111e   : > { %v4589_v11 = vmul.f32 %v2084_v0, %v4552_v29 }
0x1120   : > { %v2086_v13 = vpack.c.bf16 %v4589_v11, %v4589_v11 }
0x1122   : > { %3122 = vmatmul.mubr.bf16.vlgmr.msra.gmra.mrb[52].mxu0 %v2086_v13 }
0x1123   : > { %3132 = vmatpush3.bf16.msra.mxu0 %v3464_v14  ;;  %3133 = vmatprep.mubr.msk.bf16.mxu0 %vm3702_vm0, %v3701_v2 }
0x1124   : > { %3137 = vmatprep.subr.bf16.mxu0 %v3701_v2 }
0x11f5   : > { %v2121_v15 = vpop.f32.mrb[52].mxu0 }
0x11f6   : > { %v2698_v16 = vmul.f32 -1.442695, %v2121_v15  ;;  %v3123_v17 = vpop.f32.mrb[53].mxu0 }
0x11f7   : > { %v2124_v18 = vpop.f32.mrb[54].mxu0 }
0x11f8   : > { %3436 = vpow2.f32 %v2698_v16  ;;  %v3124_v19 = vpop.f32.mrb[55].mxu0 }
0x1202   : > { %v3437_v20 = vpop.eup %3436 }
0x1203   : > { %v2130_v21 = vadd.f32 1.0, %v3437_v20 }
0x1205   : > { %3438 = vrcp.f32 %v2130_v21 }
0x120f   : > { %v3439_v10 = vpop.eup %3438 }
0x1210   : > { %v2133_v12 = vmul.f32 2.0, %v3439_v10  ;;  %v3490_v10 = vld [vmem:[%s3994_s26] ss:$0 sm:$0xff] }
0x1212   : > { %v2134_v36 = vmul.f32 %v2133_v12, %v2033_v56 }
0x1214   : > { %v2135_v33 = vpack.c.bf16 %v2134_v36, %v2134_v36 }
0x1216   : > { %3128 = vmatmul.mubr.msk.bf16.vlgmr.msra.gmra.mrb[40].mxu1 %vm670_vm1, %v2135_v33  ;;  %3134 = vmatmul.mubr.msk.bf16.vlgmr.msra.gmra.mrb[56].mxu0 %vm670_vm1, %v2135_v33 }
0x1217   : > { %2188 = vmatpush1.bf16.msra.mxu1 %v3465_v35  ;;  %2219 = vmatprep.mubr.bf16.mxu1 %v3703_v38 }
0x1218   : > { %2269 = vmatprep.subr.bf16.mxu1 %v3466_v40  ;;  %3138 = vmatpush3.bf16.msra.mxu0 %v3467_v4  ;;  %v2372_v4 = vstv %s1981_s14 }
0x1219   : > { %3139 = vmatprep.subr.bf16.mxu0 %v3701_v2  ;;  %3153 = vmatprep.mubr.msk.bf16.mxu0 %vm3702_vm0, %v3701_v2  ;;  %vm2373_vm5 = vcmp.lt.s32.totalorder %v4246_v41, %v2372_v4 }
0x121c   : > { %3140 = vmatpush3.bf16.msra.mxu0 %v3468_v5 }
0x121d   : > { %3141 = vmatprep.subr.bf16.mxu0 %v3701_v2 }
0x121e   : > { %2701 = vmatmul.mubr.msk.bf16.vlgmr.msra.gmra.mrb[44].mxu1 %vm670_vm1, %v2135_v33 }
0x121f   : > { %2270 = vmatpush1.bf16.msra.mxu1 %v3469_v22  ;;  %2301 = vmatprep.mubr.bf16.mxu1 %v3703_v38  ;;  %v3475_v38 = vld [vmem:[%s3956_s8 + $0x30] ss:$12 sps:$4 sm:$0xff]   ;;  %s3186_s8 = smul.u32 12, %s3679_s16 }
0x1220   : > { %2271 = vmatprep.subr.bf16.mxu1 %v3470_v1  ;;  %3142 = vmatpush3.bf16.msra.mxu0 %v3471_v6 }
0x1221   : > { %3143 = vmatprep.subr.bf16.mxu0 %v3701_v2  ;;  %s2395_s24 = sadd.s32 %s3186_s8, %s3971_s12  ;;  %s4783_s12 = sand.u32 1, %s3655_s10  }
0x1222   : > { %s2708_s26 = sshll.u32 %s2395_s24, 7  ;;  %s4660_s7 = scalar_lea.sflag [#allocation7], %s4783_s12 }
0x1223   : > { %2272 = vmatpush1.bf16.msra.mxu1 %v3472_v32  ;;  %s4653_s16 = scalar_lea.hbm %s4781_s19, %s2708_s26 }
0x1224   : > { %2273 = vmatprep.subr.bf16.mxu1 %v3473_v24  ;;  %3144 = vmatpush3.bf16.msra.mxu0 %v3474_v7 }
0x1225   : > { %3145 = vmatprep.subr.bf16.mxu0 %v3701_v2 }
0x1227   : > { %2274 = vmatpush1.bf16.msra.mxu1 %v3475_v38 }
0x1228   : > { %2275 = vmatprep.subr.bf16.mxu1 %v3476_v43  ;;  %3146 = vmatpush3.bf16.msra.mxu0 %v3477_v25 }
0x1229   : > { %3147 = vmatprep.subr.bf16.mxu0 %v3701_v2 }
0x122b   : > { %2276 = vmatpush1.bf16.msra.mxu1 %v3478_v8 }
0x122c   : > { %2277 = vmatprep.subr.bf16.mxu1 %v3479_v9  ;;  %3148 = vmatpush3.bf16.msra.mxu0 %v3480_v26 }
0x122d   : > { %3149 = vmatprep.subr.bf16.mxu0 %v3701_v2 }
0x122f   : > { %2278 = vmatpush1.bf16.msra.mxu1 %v3481_v23 }
0x1230   : > { %2279 = vmatprep.subr.bf16.mxu1 %v3482_v3  ;;  %3150 = vmatpush3.bf16.msra.mxu0 %v3483_v47 }
0x1231   : > { %3151 = vmatprep.subr.bf16.mxu0 %v3701_v2 }
0x1233   : > { %2280 = vmatpush1.bf16.msra.mxu1 %v3484_v34 }
0x1234   : > { %2281 = vmatprep.subr.bf16.mxu1 %v3485_v50  ;;  %3152 = vmatpush3.bf16.msra.mxu0 %v3486_v30 }
0x1237   : > { %2282 = vmatpush1.bf16.msra.mxu1 %v3487_v27 }
0x1238   : > { %2283 = vmatprep.subr.bf16.mxu1 %v3488_v31 }
0x123b   : > { %2284 = vmatpush1.bf16.msra.mxu1 %v3489_v39 }
0x12e9   : > { %v2173_v37 = vpop.f32.mrb[40].mxu1  ;;  %v2262_v28 = vpop.f32.mrb[56].mxu0 }
0x12ea   : > { %v2700_v49 = vmul.f32 -1.442695, %v2173_v37  ;;  %v3129_v51 = vpop.f32.mrb[41].mxu1  ;;  %v3135_v52 = vpop.f32.mrb[57].mxu0  ;;  %v2263_v33 = vadd.f32 %v2262_v28, %v4261_v42 }
0x12eb   : > { %v2176_v53 = vpop.f32.mrb[42].mxu1  ;;  %v2265_v54 = vpop.f32.mrb[58].mxu0 }
0x12ec   : > { %3440 = vpow2.f32 %v2700_v49  ;;  %v3130_v2 = vpop.f32.mrb[43].mxu1  ;;  %v3136_v55 = vpop.f32.mrb[59].mxu0 }
0x12f6   : > { %v3441_v56 = vpop.eup %3440 }
0x12f7   : > { %v2182_v57 = vadd.f32 1.0, %v3441_v56 }
0x12f9   : > { %3442 = vrcp.f32 %v2182_v57 }
0x1303   : > { %v3443_v44 = vpop.eup %3442 }
0x1304   : > { %v2185_v46 = vmul.f32 2.0, %v3443_v44 }
0x1306   : > { %v2186_v58 = vmul.f32 %v2185_v46, %v4589_v11 }
0x1308   : > { %v2268_v59 = vpack.c.bf16 %v2186_v58, %v2186_v58 }
0x130a   : > { %2302 = vmatmul.mubr.bf16.vlgmr.msra.gmra.mrb[44].mxu1 %v2268_v59  ;;  %3154 = vmatmul.mubr.bf16.vlgmr.msra.gmra.mrb[60].mxu0 %v2268_v59 }
0x13dd   : > { %v2303_v60 = vpop.f32.mrb[44].mxu1  ;;  %v2344_v61 = vpop.f32.mrb[60].mxu0 }
0x13de   : > { %v3163_v62 = vadd.f32 %v2303_v60, %v4251_v45  ;;  %v2305_v63 = vpop.f32.mrb[45].mxu1  ;;  %v3155_v0 = vpop.f32.mrb[61].mxu0  ;;  %v2364_v12 = vadd.f32 %v3490_v10, %v2344_v61 }
0x13df   : > { %v2307_v13 = vpop.f32.mrb[46].mxu1  ;;  %v2347_v14 = vpop.f32.mrb[62].mxu0  ;;  %v3164_v18 = vadd.f32 %v2305_v63, %v4253_v48 }
0x13e0   : > { %v2703_v15 = vmul.f32 -1.442695, %v3163_v62  ;;  %v2308_v16 = vpop.f32.mrb[47].mxu1  ;;  %v3156_v17 = vpop.f32.mrb[63].mxu0 }
0x13e1   : > { %v2704_v11 = vmul.f32 -1.442695, %v3164_v18 }
0x13e2   : > { %3444 = vpow2.f32 %v2703_v15 }
0x13e3   : > { %3446 = vpow2.f32 %v2704_v11 }
0x13ec   : > { %v3445_v19 = vpop.eup %3444 }
0x13ed   : > { %v2354_v20 = vadd.f32 1.0, %v3445_v19  ;;  %v3447_v45 = vpop.eup %3446 }
0x13ee   : > { %v2361_v21 = vadd.f32 1.0, %v3447_v45 }
0x13ef   : > { %3448 = vrcp.f32 %v2354_v20 }
0x13f0   : > { %3450 = vrcp.f32 %v2361_v21 }
0x13f9   : > { %v3449_v36 = vpop.eup %3448 }
0x13fa   : > { %v2365_v35 = vmul.f32 %v3449_v36, %v2364_v12  ;;  %v3451_v40 = vpop.eup %3450 }
0x13fb   : > { %v2368_v5 = vsub.f32 1.0, %v3451_v40  ;;  %v2370_v42 = vmul.f32 %v3451_v40, %v2186_v58 }
0x13fc   : > { %v2366_v48 = vadd.f32 %v2365_v35, %v2263_v33 }
0x13fe   : > { %3452 = vtanh.f32 %v2366_v48 }
0x1408   : > { %v3453_v22 = vpop.eup %3452 }
0x1409   : > { %v2369_v1 = vmul.f32 %v3453_v22, %v2368_v5 }
0x140b   : > { %v2371_v6 = vadd.f32 %v2370_v42, %v2369_v1 }
0x140d   : > { %v2374_v32 = vsel %vm2373_vm5, %v2371_v6, %v4552_v29 }
0x140e   : > { %2377 = vst [vmem:[#allocation2] sm:$0xff] %v2374_v32  ;;  %2376 = vst [vmem:[%s2375_s11] sm:$0xff] %v2374_v32 }
0x140f   : > { %3576 = shalt.err (!%p3573_p11)
}
0x1410   : > { %s3577_s20 = scalar_lea.hbm %s4653_s16, 512  ;;  %s3581_s27 = scalar_lea.hbm %s4782_s9, 3072 }
0x1411   : > { %p3578_p0 = scmp.ne.s32.totalorder %s4653_s16, %s3577_s20  ;;  %p3582_p9 = scmp.lt.u32.totalorder %s4653_s16, %s4782_s9 }
0x1412   : > { %p3583_p13 = scmp.lt.u32.totalorder %s3581_s27, %s3577_s20  ;;  %p3585_p7 = scmp.lt.u32.totalorder %s3577_s20, %s4653_s16 }
0x1413   : > { %p3579_p8 = pnand %p3578_p0, %p4784_p2 }
0x1414   : > { %p3584_p5 = por %p3583_p13, %p3582_p9 }
0x1415   : > { %p3580_p12 = pneg %p3579_p8 }
0x1416   : > { %p3586_p3 = por %p3585_p7, %p3584_p5 }
0x1418   : > { %p3587_p10 = pnand %p3586_p3, %p3580_p12 }
0x141a   : > { %3590 = shalt.err (!%p3587_p10)
}
0x141b   : > { %s3705_s21 = smov 128   ;;  %s3706_s25 = smov 8  }
0x141c   : > { %3191 = dma.vmem_to_hbm [thread:$0]  (%p4784_p2), %s4655_s0, 512, %s4653_s16, %s4660_s7, %s3705_s21, %s3705_s21, %s3706_s25  }
0x141d PF: > { %s4785_s29 = sld [smem:[#allocation21_spill]]  ;;  %s4786_s5 = sld [smem:[#allocation15_spill]] }
0x141e   : > { %s4787_s6 = sld [smem:[#allocation25_spill]] }
0x1423   : > { %p3205_p4 = scmp.ge.s32.totalorder %s4785_s29, 2  ;;  %s2413_s13 = sand.u32 1, %s4786_s5  }
0x1424   : > { %p4788_p1 = scmp.ne.s32.totalorder %s4787_s6, 0  ;;  %s2414_s14 = scalar_lea.sflag [#allocation7], %s2413_s13 }
0x1426   : > { %p3201_p6 = pnand %p3205_p4, %p4788_p1 }
0x1428   : > { %3646 = dma.done.wait (!%p3201_p6), %s2414_s14, 512  }
0x1429   : > { %3648 = vsyncadd (!%p3201_p6), %s2414_s14, 4294966784  ;;  %s33_s19 = sadd.s32 1, %s4785_s29   ;;  %s4789_s8 = sld [smem:[#allocation16_spill]] }
0x142a   : > { %p30_p11 = scmp.ge.s32.totalorder %s33_s19, 8   ;;  %s4790_s11 = sld [smem:[#allocation26_spill]] }
0x142b   : > { %s4791_s12 = sld [smem:[#allocation17_spill]]  ;;  %s4792_s13 = sld [smem:[#allocation18_spill]] }
0x142c   : > { %s4793_s14 = sld [smem:[#allocation24_spill]]  ;;  %s4794_s15 = sld [smem:[#allocation19_spill]] }
0x142d   : > { %s4795_s16 = sld [smem:[#allocation20_spill]]  ;;  %s4796_s17 = sld [smem:[#allocation22_spill]] }
0x142e   : > { %s4797_s18 = sld [smem:[#allocation23_spill]]  ;;  %s4798_s0 = smov %s3655_s10 }
0x142f   : > { %s4799_s10 = smov %s4789_s8  ;;  %32 = sbr.rel (!%p30_p11) target bundleno = 28 (0x1c), region = 133 }
0x1436   :  { %2419 = vsyncpa [#allocation6], 1 }
0x1437   :  { %2421 = vsyncpa [#allocation6 + $0x1], 1 }
0x1438   :  { %2422 = vsyncpa [#allocation9], 1 }
0x1439   :  { %2424 = vsyncpa [#allocation9 + $0x1], 1 }
0x143a   :  { %2425 = vsyncpa [#allocation7], 1 }
0x143b   :  { %2427 = vsyncpa [#allocation7 + $0x1], 1 }

</bundles_post_ra>
